<compile_context>
chip_gen: v7x
topology: tpu7x:2x2x1
jax: 0.10.0
libtpu: 0.0.40
codegen_flags: <defaults>
</compile_context>

<pallas_src>
import functools
import numpy as np
import jax
import jax.numpy as jnp
from jax import lax
from jax.experimental import pallas as pl
from jax.experimental.pallas import tpu as pltpu


def _round_up(x, m):
    return (x + m - 1) // m * m


def _bn_relu(x, gamma, beta, eps=1e-5):
    """Training-mode BatchNorm (batch stats over lanes, biased var) + ReLU.

    x: (C, rows) f32, gamma/beta: (C, 1) f32.  Reductions ride the XLU (lane
    sums), rsqrt rides the EUP; the MXU stays free for the convolutions.
    """
    inv_rows = 1.0 / x.shape[1]
    mean = jnp.sum(x, axis=1, keepdims=True) * inv_rows
    cent = x - mean
    var = jnp.sum(cent * cent, axis=1, keepdims=True) * inv_rows
    scale = gamma * lax.rsqrt(var + eps)
    return jnp.maximum(cent * scale + beta, 0.0)


def _fused_layer_kernel(*refs, res_block, wp, lane_pad):
    if res_block:
        (xph_ref, masks_ref, w1_ref, g1_ref, b1_ref,
         ws1_ref, gs1_ref, bs1_ref, ws2_ref, gs2_ref, bs2_ref,
         o_ref, slab1_ref, apad_ref, slab_s_ref) = refs
    else:
        (xph_ref, masks_ref, w1_ref, g1_ref, b1_ref,
         o_ref, slab1_ref) = refs

    coutp, rows = o_ref.shape
    cinp = xph_ref.shape[0] // 4

    def mask_mul(v, sy, sx):
        # border masks are bf16 0/1 rows precomputed in the wrapper
        if sy == 0 and sx == 0:
            return v
        i = (sy + 1) * 3 + (sx + 1)
        return v * masks_ref[i:i + 1, :]

    # ---- conv1 (3x3, pad 1) fused with maxpool 2x2 via polyphase decomposition
    # xph_ref rows [a*cinp:(a+1)*cinp] hold input phase a = ay*2+ax, i.e.
    # x[n, c, 2*yp+ay, 2*xp+ax] flattened on the pooled (n, yp, xp) grid, with
    # `lane_pad` zero lanes on each side so every tap is a plain lane-offset
    # read.  Column block q = 2*dy+dx of the slab carries the im2col taps of
    # the conv output at pixel (2*yp+dy, 2*xp+dx).
    tap_cache = {}

    def in_tap(a, sy, sx):
        key = (a, sy, sx)
        if key not in tap_cache:
            c0 = lane_pad + sy * wp + sx
            v = xph_ref[a * cinp:(a + 1) * cinp, c0:c0 + rows]
            tap_cache[key] = mask_mul(v, sy, sx)
        return tap_cache[key]

    for dy in range(2):
        for dx in range(2):
            q = dy * 2 + dx
            for ky in range(3):
                for kx in range(3):
                    uy, ux = dy + ky - 1, dx + kx - 1
                    sy, ay = uy // 2, uy % 2
                    sx, ax = ux // 2, ux % 2
                    k = ky * 3 + kx
                    slab1_ref[k * cinp:(k + 1) * cinp,
                              q * rows:(q + 1) * rows] = in_tap(ay * 2 + ax, sy, sx)

    # one im2col matmul for all 4 phases: (coutp, 9*cinp) x (9*cinp, 4*rows)
    c1 = jnp.dot(w1_ref[...], slab1_ref[...], preferred_element_type=jnp.float32)

    # maxpool 2x2 stride 2 = max over the 4 phases (aligned 128-lane blocks)
    pooled = jnp.maximum(
        jnp.maximum(c1[:, 0 * rows:1 * rows], c1[:, 1 * rows:2 * rows]),
        jnp.maximum(c1[:, 2 * rows:3 * rows], c1[:, 3 * rows:4 * rows]))

    out1 = _bn_relu(pooled, g1_ref[...], b1_ref[...])        # (coutp, rows) f32

    # ---- shortcut: [conv3x3 -> bn -> relu] x 2, or identity -------------------
    if res_block:
        zpad = jnp.zeros((coutp, lane_pad), jnp.bfloat16)

        def conv_bn_relu(act_f32, w_ref, g_ref, b_ref):
            # explicit pad re-zero each time (cheap; keeps the zero border
            # guaranteed even if the interior store pattern changes later)
            apad_ref[:, 0:lane_pad] = zpad
            apad_ref[:, lane_pad + rows:lane_pad + rows + lane_pad] = zpad
            apad_ref[:, lane_pad:lane_pad + rows] = act_f32.astype(jnp.bfloat16)
            for ky in range(3):
                for kx in range(3):
                    sy, sx = ky - 1, kx - 1
                    c0 = lane_pad + sy * wp + sx
                    v = apad_ref[:, c0:c0 + rows]
                    k = ky * 3 + kx
                    slab_s_ref[k * coutp:(k + 1) * coutp, :] = mask_mul(v, sy, sx)
            c = jnp.dot(w_ref[...], slab_s_ref[...],
                        preferred_element_type=jnp.float32)
            return _bn_relu(c, g_ref[...], b_ref[...])

        r = conv_bn_relu(out1, ws1_ref, gs1_ref, bs1_ref)
        r = conv_bn_relu(r, ws2_ref, gs2_ref, bs2_ref)
    else:
        r = out1                                             # empty nn.Sequential

    o_ref[...] = out1 + r


# ----------------------------------------------------------------------------
# Layer.forward wrapper (NCHW in / NCHW out; single pallas_call)
# ----------------------------------------------------------------------------
@functools.partial(jax.jit, static_argnames=("res_block",))
def layer_forward(x_nchw, params, *, res_block):
    n, cin, h, w = x_nchw.shape
    cout = params["w1"].shape[-1]
    hp, wp = h // 2, w // 2
    rows = n * hp * wp
    cinp = _round_up(cin, 8)
    coutp = _round_up(cout, 8)
    lane_pad = _round_up(wp + 1, 128)

    # ---- layout plumbing in plain XLA (outside the kernel) --------------------
    # 2x2 polyphase split, channel pad to a multiple of 8, channel-major flatten
    # on the pooled (n, hp, wp) grid, and zero lane pads for the tap reads.
    xb = jnp.pad(x_nchw.astype(jnp.bfloat16),
                 ((0, 0), (0, cinp - cin), (0, 0), (0, 0)))
    phases = []
    for ay in range(2):
        for ax in range(2):
            p = xb[:, :, ay::2, ax::2]                        # (n, cinp, hp, wp)
            phases.append(jnp.transpose(p, (1, 0, 2, 3)).reshape(cinp, rows))
    x_ph = jnp.concatenate(phases, axis=0)                    # (4*cinp, rows)
    x_ph = jnp.pad(x_ph, ((0, 0), (lane_pad, lane_pad)))      # zero lane pads

    # border-validity masks (bf16 0/1) for neighbor offsets (sy, sx) in {-1,0,1}^2
    yy = jnp.broadcast_to(jnp.arange(hp).reshape(1, hp, 1), (n, hp, wp))
    xx = jnp.broadcast_to(jnp.arange(wp).reshape(1, 1, wp), (n, hp, wp))
    masks = []
    for sy in (-1, 0, 1):
        for sx in (-1, 0, 1):
            ok = ((yy + sy >= 0) & (yy + sy < hp) &
                  (xx + sx >= 0) & (xx + sx < wp))
            masks.append(ok.reshape(rows))
    border_masks = jnp.stack(masks, axis=0).astype(jnp.bfloat16)   # (9, rows)

    def wmat(wk, ci_pad, co_pad):
        # (3,3,ci,co) -> (co_pad, 9*ci_pad) bf16, K laid out tap-major (ky,kx,ci)
        wk = jnp.pad(wk, ((0, 0), (0, 0),
                          (0, ci_pad - wk.shape[2]),
                          (0, co_pad - wk.shape[3])))
        return jnp.transpose(wk, (3, 0, 1, 2)).reshape(co_pad, -1).astype(jnp.bfloat16)

    def col(v, pad_val):
        v = jnp.pad(v, (0, coutp - v.shape[0]), constant_values=pad_val)
        return v.reshape(coutp, 1).astype(jnp.float32)

    inputs = [x_ph, border_masks, wmat(params["w1"], cinp, coutp),
              col(params["g1"], 1.0), col(params["b1"], 0.0)]
    scratch = [pltpu.VMEM((9 * cinp, 4 * rows), jnp.bfloat16)]   # conv1 im2col slab
    if res_block:
        inputs += [wmat(params["ws1"], coutp, coutp),
                   col(params["gs1"], 1.0), col(params["bs1"], 0.0),
                   wmat(params["ws2"], coutp, coutp),
                   col(params["gs2"], 1.0), col(params["bs2"], 0.0)]
        scratch += [pltpu.VMEM((coutp, rows + 2 * lane_pad), jnp.bfloat16),  # padded act
                    pltpu.VMEM((9 * coutp, rows), jnp.bfloat16)]             # shortcut slab

    out2d = pl.pallas_call(
        functools.partial(_fused_layer_kernel, res_block=res_block,
                          wp=wp, lane_pad=lane_pad),
        out_shape=jax.ShapeDtypeStruct((coutp, rows), jnp.float32),
        scratch_shapes=scratch,
    )(*inputs)

    out = out2d[:cout].reshape(cout, n, hp, wp)
    return jnp.transpose(out, (1, 0, 2, 3))                   # channel-major -> NCHW


# ----------------------------------------------------------------------------
# Pure-JAX reference (same semantics) for a correctness check.
# ----------------------------------------------------------------------------
def reference_forward(x_nchw, params, *, res_block):
    def conv(x, w_hwio):
        return lax.conv_general_dilated(
            x, jnp.transpose(w_hwio, (3, 2, 0, 1)),
            window_strides=(1, 1), padding=((1, 1), (1, 1)),
            dimension_numbers=("NCHW", "OIHW", "NCHW"))

    def bn_relu(x, g, b, eps=1e-5):
        mean = jnp.mean(x, axis=(0, 2, 3), keepdims=True)
        var = jnp.mean((x - mean) ** 2, axis=(0, 2, 3), keepdims=True)
        y = (x - mean) / jnp.sqrt(var + eps)
        y = y * g.reshape(1, -1, 1, 1) + b.reshape(1, -1, 1, 1)
        return jnp.maximum(y, 0.0)

    out = conv(x_nchw, params["w1"])
    out = lax.reduce_window(out, -jnp.inf, lax.max,
                            (1, 1, 2, 2), (1, 1, 2, 2), "VALID")
    out = bn_relu(out, params["g1"], params["b1"])
    if res_block:
        r = conv(out, params["ws1"])
        r = bn_relu(r, params["gs1"], params["bs1"])
        r = conv(r, params["ws2"])
        r = bn_relu(r, params["gs2"], params["bs2"])
    else:
        r = out
    return out + r


if __name__ == "__main__":
    in_planes, planes = 4, 8
    N, H, W = 2, 16, 16

    key = jax.random.PRNGKey(0)
    ks = jax.random.split(key, 10)
    params = {
        "w1":  0.2 * jax.random.normal(ks[0], (3, 3, in_planes, planes), jnp.float32),
        "g1":  1.0 + 0.1 * jax.random.normal(ks[1], (planes,), jnp.float32),
        "b1":  0.05 * jax.random.normal(ks[2], (planes,), jnp.float32),
        "ws1": 0.2 * jax.random.normal(ks[3], (3, 3, planes, planes), jnp.float32),
        "gs1": 1.0 + 0.1 * jax.random.normal(ks[4], (planes,), jnp.float32),
        "bs1": 0.05 * jax.random.normal(ks[5], (planes,), jnp.float32),
        "ws2": 0.2 * jax.random.normal(ks[6], (3, 3, planes, planes), jnp.float32),
        "gs2": 1.0 + 0.1 * jax.random.normal(ks[7], (planes,), jnp.float32),
        "bs2": 0.05 * jax.random.normal(ks[8], (planes,), jnp.float32),
    }
    x = jax.random.normal(ks[9], (N, in_planes, H, W), jnp.float32)

    for res_block in (True, False):
        out = jax.block_until_ready(layer_forward(x, params, res_block=res_block))
        ref = reference_forward(x, params, res_block=res_block)
        np.testing.assert_allclose(np.asarray(out), np.asarray(ref),
                                   rtol=5e-2, atol=5e-2)
        assert out.shape == (N, planes, H // 2, W // 2)
    print("KERNEL_OK")
</pallas_src>

<mosaic_0001>
module attributes {stable_mosaic.version = 11 : i64} {
  func.func @_fused_layer_kernel(%arg0: memref<32x384xbf16, #tpu.memory_space<vmem>>, %arg1: memref<9x128xbf16, #tpu.memory_space<vmem>>, %arg2: memref<8x72xbf16, #tpu.memory_space<vmem>>, %arg3: memref<8x1xf32, #tpu.memory_space<vmem>>, %arg4: memref<8x1xf32, #tpu.memory_space<vmem>>, %arg5: memref<8x72xbf16, #tpu.memory_space<vmem>>, %arg6: memref<8x1xf32, #tpu.memory_space<vmem>>, %arg7: memref<8x1xf32, #tpu.memory_space<vmem>>, %arg8: memref<8x72xbf16, #tpu.memory_space<vmem>>, %arg9: memref<8x1xf32, #tpu.memory_space<vmem>>, %arg10: memref<8x1xf32, #tpu.memory_space<vmem>>, %arg11: memref<8x128xf32, #tpu.memory_space<vmem>>, %arg12: memref<72x512xbf16, #tpu.memory_space<vmem>>, %arg13: memref<8x384xbf16, #tpu.memory_space<vmem>>, %arg14: memref<72x128xbf16, #tpu.memory_space<vmem>>) attributes {dimension_semantics = [], scalar_prefetch = 0 : i64, scratch_operands = 3 : i64, tpu.core_type = #tpu.core_type<tc>} {
    %c24 = arith.constant 24 : index
    %c119 = arith.constant 119 : index
    %0 = vector.load %arg0[%c24, %c119] : memref<32x384xbf16, #tpu.memory_space<vmem>>, vector<8x128xbf16>
    %c0 = arith.constant 0 : index
    %c0_0 = arith.constant 0 : index
    %1 = vector.load %arg1[%c0, %c0_0] : memref<9x128xbf16, #tpu.memory_space<vmem>>, vector<1x128xbf16>
    %2 = vector.broadcast %1 : vector<1x128xbf16> to vector<8x128xbf16>
    %3 = arith.mulf %0, %2 : vector<8x128xbf16>
    %c0_1 = arith.constant 0 : index
    %c0_2 = arith.constant 0 : index
    %4 = vector.load %arg12[%c0_1, %c0_2] : memref<72x512xbf16, #tpu.memory_space<vmem>>, vector<8x128xbf16>
    tpu.vector_store %arg12[%c0_1, %c0_2], %3 {strides = array<i32>} : memref<72x512xbf16, #tpu.memory_space<vmem>>, vector<8x128xbf16>,
    %c16 = arith.constant 16 : index
    %c120 = arith.constant 120 : index
    %5 = vector.load %arg0[%c16, %c120] : memref<32x384xbf16, #tpu.memory_space<vmem>>, vector<8x128xbf16>
    %c1 = arith.constant 1 : index
    %c0_3 = arith.constant 0 : index
    %6 = vector.load %arg1[%c1, %c0_3] : memref<9x128xbf16, #tpu.memory_space<vmem>>, vector<1x128xbf16>
    %7 = vector.broadcast %6 : vector<1x128xbf16> to vector<8x128xbf16>
    %8 = arith.mulf %5, %7 : vector<8x128xbf16>
    %c8 = arith.constant 8 : index
    %c0_4 = arith.constant 0 : index
    %9 = vector.load %arg12[%c8, %c0_4] : memref<72x512xbf16, #tpu.memory_space<vmem>>, vector<8x128xbf16>
    tpu.vector_store %arg12[%c8, %c0_4], %8 {strides = array<i32>} : memref<72x512xbf16, #tpu.memory_space<vmem>>, vector<8x128xbf16>,
    %c24_5 = arith.constant 24 : index
    %c120_6 = arith.constant 120 : index
    %10 = vector.load %arg0[%c24_5, %c120_6] : memref<32x384xbf16, #tpu.memory_space<vmem>>, vector<8x128xbf16>
    %c1_7 = arith.constant 1 : index
    %c0_8 = arith.constant 0 : index
    %11 = vector.load %arg1[%c1_7, %c0_8] : memref<9x128xbf16, #tpu.memory_space<vmem>>, vector<1x128xbf16>
    %12 = vector.broadcast %11 : vector<1x128xbf16> to vector<8x128xbf16>
    %13 = arith.mulf %10, %12 : vector<8x128xbf16>
    %c16_9 = arith.constant 16 : index
    %c0_10 = arith.constant 0 : index
    %14 = vector.load %arg12[%c16_9, %c0_10] : memref<72x512xbf16, #tpu.memory_space<vmem>>, vector<8x128xbf16>
    tpu.vector_store %arg12[%c16_9, %c0_10], %13 {strides = array<i32>} : memref<72x512xbf16, #tpu.memory_space<vmem>>, vector<8x128xbf16>,
    %c8_11 = arith.constant 8 : index
    %c127 = arith.constant 127 : index
    %15 = vector.load %arg0[%c8_11, %c127] : memref<32x384xbf16, #tpu.memory_space<vmem>>, vector<8x128xbf16>
    %c3 = arith.constant 3 : index
    %c0_12 = arith.constant 0 : index
    %16 = vector.load %arg1[%c3, %c0_12] : memref<9x128xbf16, #tpu.memory_space<vmem>>, vector<1x128xbf16>
    %17 = vector.broadcast %16 : vector<1x128xbf16> to vector<8x128xbf16>
    %18 = arith.mulf %15, %17 : vector<8x128xbf16>
    %c24_13 = arith.constant 24 : index
    %c0_14 = arith.constant 0 : index
    %19 = vector.load %arg12[%c24_13, %c0_14] : memref<72x512xbf16, #tpu.memory_space<vmem>>, vector<8x128xbf16>
    tpu.vector_store %arg12[%c24_13, %c0_14], %18 {strides = array<i32>} : memref<72x512xbf16, #tpu.memory_space<vmem>>, vector<8x128xbf16>,
    %c0_15 = arith.constant 0 : index
    %c128 = arith.constant 128 : index
    %20 = vector.load %arg0[%c0_15, %c128] : memref<32x384xbf16, #tpu.memory_space<vmem>>, vector<8x128xbf16>
    %c32 = arith.constant 32 : index
    %c0_16 = arith.constant 0 : index
    %21 = vector.load %arg12[%c32, %c0_16] : memref<72x512xbf16, #tpu.memory_space<vmem>>, vector<8x128xbf16>
    tpu.vector_store %arg12[%c32, %c0_16], %20 {strides = array<i32>} : memref<72x512xbf16, #tpu.memory_space<vmem>>, vector<8x128xbf16>,
    %c8_17 = arith.constant 8 : index
    %c128_18 = arith.constant 128 : index
    %22 = vector.load %arg0[%c8_17, %c128_18] : memref<32x384xbf16, #tpu.memory_space<vmem>>, vector<8x128xbf16>
    %c40 = arith.constant 40 : index
    %c0_19 = arith.constant 0 : index
    %23 = vector.load %arg12[%c40, %c0_19] : memref<72x512xbf16, #tpu.memory_space<vmem>>, vector<8x128xbf16>
    tpu.vector_store %arg12[%c40, %c0_19], %22 {strides = array<i32>} : memref<72x512xbf16, #tpu.memory_space<vmem>>, vector<8x128xbf16>,
    %c24_20 = arith.constant 24 : index
    %c127_21 = arith.constant 127 : index
    %24 = vector.load %arg0[%c24_20, %c127_21] : memref<32x384xbf16, #tpu.memory_space<vmem>>, vector<8x128xbf16>
    %c3_22 = arith.constant 3 : index
    %c0_23 = arith.constant 0 : index
    %25 = vector.load %arg1[%c3_22, %c0_23] : memref<9x128xbf16, #tpu.memory_space<vmem>>, vector<1x128xbf16>
    %26 = vector.broadcast %25 : vector<1x128xbf16> to vector<8x128xbf16>
    %27 = arith.mulf %24, %26 : vector<8x128xbf16>
    %c48 = arith.constant 48 : index
    %c0_24 = arith.constant 0 : index
    %28 = vector.load %arg12[%c48, %c0_24] : memref<72x512xbf16, #tpu.memory_space<vmem>>, vector<8x128xbf16>
    tpu.vector_store %arg12[%c48, %c0_24], %27 {strides = array<i32>} : memref<72x512xbf16, #tpu.memory_space<vmem>>, vector<8x128xbf16>,
    %c16_25 = arith.constant 16 : index
    %c128_26 = arith.constant 128 : index
    %29 = vector.load %arg0[%c16_25, %c128_26] : memref<32x384xbf16, #tpu.memory_space<vmem>>, vector<8x128xbf16>
    %c56 = arith.constant 56 : index
    %c0_27 = arith.constant 0 : index
    %30 = vector.load %arg12[%c56, %c0_27] : memref<72x512xbf16, #tpu.memory_space<vmem>>, vector<8x128xbf16>
    tpu.vector_store %arg12[%c56, %c0_27], %29 {strides = array<i32>} : memref<72x512xbf16, #tpu.memory_space<vmem>>, vector<8x128xbf16>,
    %c24_28 = arith.constant 24 : index
    %c128_29 = arith.constant 128 : index
    %31 = vector.load %arg0[%c24_28, %c128_29] : memref<32x384xbf16, #tpu.memory_space<vmem>>, vector<8x128xbf16>
    %c64 = arith.constant 64 : index
    %c0_30 = arith.constant 0 : index
    %32 = vector.load %arg12[%c64, %c0_30] : memref<72x512xbf16, #tpu.memory_space<vmem>>, vector<8x128xbf16>
    tpu.vector_store %arg12[%c64, %c0_30], %31 {strides = array<i32>} : memref<72x512xbf16, #tpu.memory_space<vmem>>, vector<8x128xbf16>,
    %c0_31 = arith.constant 0 : index
    %c128_32 = arith.constant 128 : index
    %33 = vector.load %arg12[%c0_31, %c128_32] : memref<72x512xbf16, #tpu.memory_space<vmem>>, vector<8x128xbf16>
    tpu.vector_store %arg12[%c0_31, %c128_32], %8 {strides = array<i32>} : memref<72x512xbf16, #tpu.memory_space<vmem>>, vector<8x128xbf16>,
    %c8_33 = arith.constant 8 : index
    %c128_34 = arith.constant 128 : index
    %34 = vector.load %arg12[%c8_33, %c128_34] : memref<72x512xbf16, #tpu.memory_space<vmem>>, vector<8x128xbf16>
    tpu.vector_store %arg12[%c8_33, %c128_34], %13 {strides = array<i32>} : memref<72x512xbf16, #tpu.memory_space<vmem>>, vector<8x128xbf16>,
    %c16_35 = arith.constant 16 : index
    %c121 = arith.constant 121 : index
    %35 = vector.load %arg0[%c16_35, %c121] : memref<32x384xbf16, #tpu.memory_space<vmem>>, vector<8x128xbf16>
    %c2 = arith.constant 2 : index
    %c0_36 = arith.constant 0 : index
    %36 = vector.load %arg1[%c2, %c0_36] : memref<9x128xbf16, #tpu.memory_space<vmem>>, vector<1x128xbf16>
    %37 = vector.broadcast %36 : vector<1x128xbf16> to vector<8x128xbf16>
    %38 = arith.mulf %35, %37 : vector<8x128xbf16>
    %c16_37 = arith.constant 16 : index
    %c128_38 = arith.constant 128 : index
    %39 = vector.load %arg12[%c16_37, %c128_38] : memref<72x512xbf16, #tpu.memory_space<vmem>>, vector<8x128xbf16>
    tpu.vector_store %arg12[%c16_37, %c128_38], %38 {strides = array<i32>} : memref<72x512xbf16, #tpu.memory_space<vmem>>, vector<8x128xbf16>,
    %c24_39 = arith.constant 24 : index
    %c128_40 = arith.constant 128 : index
    %40 = vector.load %arg12[%c24_39, %c128_40] : memref<72x512xbf16, #tpu.memory_space<vmem>>, vector<8x128xbf16>
    tpu.vector_store %arg12[%c24_39, %c128_40], %20 {strides = array<i32>} : memref<72x512xbf16, #tpu.memory_space<vmem>>, vector<8x128xbf16>,
    %c32_41 = arith.constant 32 : index
    %c128_42 = arith.constant 128 : index
    %41 = vector.load %arg12[%c32_41, %c128_42] : memref<72x512xbf16, #tpu.memory_space<vmem>>, vector<8x128xbf16>
    tpu.vector_store %arg12[%c32_41, %c128_42], %22 {strides = array<i32>} : memref<72x512xbf16, #tpu.memory_space<vmem>>, vector<8x128xbf16>,
    %c0_43 = arith.constant 0 : index
    %c129 = arith.constant 129 : index
    %42 = vector.load %arg0[%c0_43, %c129] : memref<32x384xbf16, #tpu.memory_space<vmem>>, vector<8x128xbf16>
    %c5 = arith.constant 5 : index
    %c0_44 = arith.constant 0 : index
    %43 = vector.load %arg1[%c5, %c0_44] : memref<9x128xbf16, #tpu.memory_space<vmem>>, vector<1x128xbf16>
    %44 = vector.broadcast %43 : vector<1x128xbf16> to vector<8x128xbf16>
    %45 = arith.mulf %42, %44 : vector<8x128xbf16>
    %c40_45 = arith.constant 40 : index
    %c128_46 = arith.constant 128 : index
    %46 = vector.load %arg12[%c40_45, %c128_46] : memref<72x512xbf16, #tpu.memory_space<vmem>>, vector<8x128xbf16>
    tpu.vector_store %arg12[%c40_45, %c128_46], %45 {strides = array<i32>} : memref<72x512xbf16, #tpu.memory_space<vmem>>, vector<8x128xbf16>,
    %c48_47 = arith.constant 48 : index
    %c128_48 = arith.constant 128 : index
    %47 = vector.load %arg12[%c48_47, %c128_48] : memref<72x512xbf16, #tpu.memory_space<vmem>>, vector<8x128xbf16>
    tpu.vector_store %arg12[%c48_47, %c128_48], %29 {strides = array<i32>} : memref<72x512xbf16, #tpu.memory_space<vmem>>, vector<8x128xbf16>,
    %c56_49 = arith.constant 56 : index
    %c128_50 = arith.constant 128 : index
    %48 = vector.load %arg12[%c56_49, %c128_50] : memref<72x512xbf16, #tpu.memory_space<vmem>>, vector<8x128xbf16>
    tpu.vector_store %arg12[%c56_49, %c128_50], %31 {strides = array<i32>} : memref<72x512xbf16, #tpu.memory_space<vmem>>, vector<8x128xbf16>,
    %c16_51 = arith.constant 16 : index
    %c129_52 = arith.constant 129 : index
    %49 = vector.load %arg0[%c16_51, %c129_52] : memref<32x384xbf16, #tpu.memory_space<vmem>>, vector<8x128xbf16>
    %c5_53 = arith.constant 5 : index
    %c0_54 = arith.constant 0 : index
    %50 = vector.load %arg1[%c5_53, %c0_54] : memref<9x128xbf16, #tpu.memory_space<vmem>>, vector<1x128xbf16>
    %51 = vector.broadcast %50 : vector<1x128xbf16> to vector<8x128xbf16>
    %52 = arith.mulf %49, %51 : vector<8x128xbf16>
    %c64_55 = arith.constant 64 : index
    %c128_56 = arith.constant 128 : index
    %53 = vector.load %arg12[%c64_55, %c128_56] : memref<72x512xbf16, #tpu.memory_space<vmem>>, vector<8x128xbf16>
    tpu.vector_store %arg12[%c64_55, %c128_56], %52 {strides = array<i32>} : memref<72x512xbf16, #tpu.memory_space<vmem>>, vector<8x128xbf16>,
    %c0_57 = arith.constant 0 : index
    %c256 = arith.constant 256 : index
    %54 = vector.load %arg12[%c0_57, %c256] : memref<72x512xbf16, #tpu.memory_space<vmem>>, vector<8x128xbf16>
    tpu.vector_store %arg12[%c0_57, %c256], %18 {strides = array<i32>} : memref<72x512xbf16, #tpu.memory_space<vmem>>, vector<8x128xbf16>,
    %c8_58 = arith.constant 8 : index
    %c256_59 = arith.constant 256 : index
    %55 = vector.load %arg12[%c8_58, %c256_59] : memref<72x512xbf16, #tpu.memory_space<vmem>>, vector<8x128xbf16>
    tpu.vector_store %arg12[%c8_58, %c256_59], %20 {strides = array<i32>} : memref<72x512xbf16, #tpu.memory_space<vmem>>, vector<8x128xbf16>,
    %c16_60 = arith.constant 16 : index
    %c256_61 = arith.constant 256 : index
    %56 = vector.load %arg12[%c16_60, %c256_61] : memref<72x512xbf16, #tpu.memory_space<vmem>>, vector<8x128xbf16>
    tpu.vector_store %arg12[%c16_60, %c256_61], %22 {strides = array<i32>} : memref<72x512xbf16, #tpu.memory_space<vmem>>, vector<8x128xbf16>,
    %c24_62 = arith.constant 24 : index
    %c256_63 = arith.constant 256 : index
    %57 = vector.load %arg12[%c24_62, %c256_63] : memref<72x512xbf16, #tpu.memory_space<vmem>>, vector<8x128xbf16>
    tpu.vector_store %arg12[%c24_62, %c256_63], %27 {strides = array<i32>} : memref<72x512xbf16, #tpu.memory_space<vmem>>, vector<8x128xbf16>,
    %c32_64 = arith.constant 32 : index
    %c256_65 = arith.constant 256 : index
    %58 = vector.load %arg12[%c32_64, %c256_65] : memref<72x512xbf16, #tpu.memory_space<vmem>>, vector<8x128xbf16>
    tpu.vector_store %arg12[%c32_64, %c256_65], %29 {strides = array<i32>} : memref<72x512xbf16, #tpu.memory_space<vmem>>, vector<8x128xbf16>,
    %c40_66 = arith.constant 40 : index
    %c256_67 = arith.constant 256 : index
    %59 = vector.load %arg12[%c40_66, %c256_67] : memref<72x512xbf16, #tpu.memory_space<vmem>>, vector<8x128xbf16>
    tpu.vector_store %arg12[%c40_66, %c256_67], %31 {strides = array<i32>} : memref<72x512xbf16, #tpu.memory_space<vmem>>, vector<8x128xbf16>,
    %c8_68 = arith.constant 8 : index
    %c135 = arith.constant 135 : index
    %60 = vector.load %arg0[%c8_68, %c135] : memref<32x384xbf16, #tpu.memory_space<vmem>>, vector<8x128xbf16>
    %c6 = arith.constant 6 : index
    %c0_69 = arith.constant 0 : index
    %61 = vector.load %arg1[%c6, %c0_69] : memref<9x128xbf16, #tpu.memory_space<vmem>>, vector<1x128xbf16>
    %62 = vector.broadcast %61 : vector<1x128xbf16> to vector<8x128xbf16>
    %63 = arith.mulf %60, %62 : vector<8x128xbf16>
    %c48_70 = arith.constant 48 : index
    %c256_71 = arith.constant 256 : index
    %64 = vector.load %arg12[%c48_70, %c256_71] : memref<72x512xbf16, #tpu.memory_space<vmem>>, vector<8x128xbf16>
    tpu.vector_store %arg12[%c48_70, %c256_71], %63 {strides = array<i32>} : memref<72x512xbf16, #tpu.memory_space<vmem>>, vector<8x128xbf16>,
    %c0_72 = arith.constant 0 : index
    %c136 = arith.constant 136 : index
    %65 = vector.load %arg0[%c0_72, %c136] : memref<32x384xbf16, #tpu.memory_space<vmem>>, vector<8x128xbf16>
    %c7 = arith.constant 7 : index
    %c0_73 = arith.constant 0 : index
    %66 = vector.load %arg1[%c7, %c0_73] : memref<9x128xbf16, #tpu.memory_space<vmem>>, vector<1x128xbf16>
    %67 = vector.broadcast %66 : vector<1x128xbf16> to vector<8x128xbf16>
    %68 = arith.mulf %65, %67 : vector<8x128xbf16>
    %c56_74 = arith.constant 56 : index
    %c256_75 = arith.constant 256 : index
    %69 = vector.load %arg12[%c56_74, %c256_75] : memref<72x512xbf16, #tpu.memory_space<vmem>>, vector<8x128xbf16>
    tpu.vector_store %arg12[%c56_74, %c256_75], %68 {strides = array<i32>} : memref<72x512xbf16, #tpu.memory_space<vmem>>, vector<8x128xbf16>,
    %c8_76 = arith.constant 8 : index
    %c136_77 = arith.constant 136 : index
    %70 = vector.load %arg0[%c8_76, %c136_77] : memref<32x384xbf16, #tpu.memory_space<vmem>>, vector<8x128xbf16>
    %c7_78 = arith.constant 7 : index
    %c0_79 = arith.constant 0 : index
    %71 = vector.load %arg1[%c7_78, %c0_79] : memref<9x128xbf16, #tpu.memory_space<vmem>>, vector<1x128xbf16>
    %72 = vector.broadcast %71 : vector<1x128xbf16> to vector<8x128xbf16>
    %73 = arith.mulf %70, %72 : vector<8x128xbf16>
    %c64_80 = arith.constant 64 : index
    %c256_81 = arith.constant 256 : index
    %74 = vector.load %arg12[%c64_80, %c256_81] : memref<72x512xbf16, #tpu.memory_space<vmem>>, vector<8x128xbf16>
    tpu.vector_store %arg12[%c64_80, %c256_81], %73 {strides = array<i32>} : memref<72x512xbf16, #tpu.memory_space<vmem>>, vector<8x128xbf16>,
    %c0_82 = arith.constant 0 : index
    %c384 = arith.constant 384 : index
    %75 = vector.load %arg12[%c0_82, %c384] : memref<72x512xbf16, #tpu.memory_space<vmem>>, vector<8x128xbf16>
    tpu.vector_store %arg12[%c0_82, %c384], %20 {strides = array<i32>} : memref<72x512xbf16, #tpu.memory_space<vmem>>, vector<8x128xbf16>,
    %c8_83 = arith.constant 8 : index
    %c384_84 = arith.constant 384 : index
    %76 = vector.load %arg12[%c8_83, %c384_84] : memref<72x512xbf16, #tpu.memory_space<vmem>>, vector<8x128xbf16>
    tpu.vector_store %arg12[%c8_83, %c384_84], %22 {strides = array<i32>} : memref<72x512xbf16, #tpu.memory_space<vmem>>, vector<8x128xbf16>,
    %c16_85 = arith.constant 16 : index
    %c384_86 = arith.constant 384 : index
    %77 = vector.load %arg12[%c16_85, %c384_86] : memref<72x512xbf16, #tpu.memory_space<vmem>>, vector<8x128xbf16>
    tpu.vector_store %arg12[%c16_85, %c384_86], %45 {strides = array<i32>} : memref<72x512xbf16, #tpu.memory_space<vmem>>, vector<8x128xbf16>,
    %c24_87 = arith.constant 24 : index
    %c384_88 = arith.constant 384 : index
    %78 = vector.load %arg12[%c24_87, %c384_88] : memref<72x512xbf16, #tpu.memory_space<vmem>>, vector<8x128xbf16>
    tpu.vector_store %arg12[%c24_87, %c384_88], %29 {strides = array<i32>} : memref<72x512xbf16, #tpu.memory_space<vmem>>, vector<8x128xbf16>,
    %c32_89 = arith.constant 32 : index
    %c384_90 = arith.constant 384 : index
    %79 = vector.load %arg12[%c32_89, %c384_90] : memref<72x512xbf16, #tpu.memory_space<vmem>>, vector<8x128xbf16>
    tpu.vector_store %arg12[%c32_89, %c384_90], %31 {strides = array<i32>} : memref<72x512xbf16, #tpu.memory_space<vmem>>, vector<8x128xbf16>,
    %c40_91 = arith.constant 40 : index
    %c384_92 = arith.constant 384 : index
    %80 = vector.load %arg12[%c40_91, %c384_92] : memref<72x512xbf16, #tpu.memory_space<vmem>>, vector<8x128xbf16>
    tpu.vector_store %arg12[%c40_91, %c384_92], %52 {strides = array<i32>} : memref<72x512xbf16, #tpu.memory_space<vmem>>, vector<8x128xbf16>,
    %c48_93 = arith.constant 48 : index
    %c384_94 = arith.constant 384 : index
    %81 = vector.load %arg12[%c48_93, %c384_94] : memref<72x512xbf16, #tpu.memory_space<vmem>>, vector<8x128xbf16>
    tpu.vector_store %arg12[%c48_93, %c384_94], %68 {strides = array<i32>} : memref<72x512xbf16, #tpu.memory_space<vmem>>, vector<8x128xbf16>,
    %c56_95 = arith.constant 56 : index
    %c384_96 = arith.constant 384 : index
    %82 = vector.load %arg12[%c56_95, %c384_96] : memref<72x512xbf16, #tpu.memory_space<vmem>>, vector<8x128xbf16>
    tpu.vector_store %arg12[%c56_95, %c384_96], %73 {strides = array<i32>} : memref<72x512xbf16, #tpu.memory_space<vmem>>, vector<8x128xbf16>,
    %c0_97 = arith.constant 0 : index
    %c137 = arith.constant 137 : index
    %83 = vector.load %arg0[%c0_97, %c137] : memref<32x384xbf16, #tpu.memory_space<vmem>>, vector<8x128xbf16>
    %c8_98 = arith.constant 8 : index
    %c0_99 = arith.constant 0 : index
    %84 = vector.load %arg1[%c8_98, %c0_99] : memref<9x128xbf16, #tpu.memory_space<vmem>>, vector<1x128xbf16>
    %85 = vector.broadcast %84 : vector<1x128xbf16> to vector<8x128xbf16>
    %86 = arith.mulf %83, %85 : vector<8x128xbf16>
    %c64_100 = arith.constant 64 : index
    %c384_101 = arith.constant 384 : index
    %87 = vector.load %arg12[%c64_100, %c384_101] : memref<72x512xbf16, #tpu.memory_space<vmem>>, vector<8x128xbf16>
    tpu.vector_store %arg12[%c64_100, %c384_101], %86 {strides = array<i32>} : memref<72x512xbf16, #tpu.memory_space<vmem>>, vector<8x128xbf16>,
    %c0_102 = arith.constant 0 : index
    %c0_103 = arith.constant 0 : index
    %88 = vector.load %arg2[%c0_102, %c0_103] : memref<8x72xbf16, #tpu.memory_space<vmem>>, vector<8x72xbf16>
    %c0_104 = arith.constant 0 : index
    %c0_105 = arith.constant 0 : index
    %89 = vector.load %arg12[%c0_104, %c0_105] : memref<72x512xbf16, #tpu.memory_space<vmem>>, vector<72x512xbf16>
    %cst = arith.constant dense<0.000000e+00> : vector<8x512xf32>
    %90 = tpu.matmul %88, %89, %cst {dimension_numbers = #tpu.dot_dimension_numbers<[1], [0], [0], [1], [0, 0, 1, 1], [], []>} : vector<8x72xbf16>, vector<72x512xbf16>, vector<8x512xf32> -> vector<8x512xf32>
    %91 = vector.extract_strided_slice %90 {offsets = [0, 0], sizes = [8, 128], strides = [1, 1]} : vector<8x512xf32> to vector<8x128xf32>
    %92 = vector.extract_strided_slice %90 {offsets = [0, 128], sizes = [8, 128], strides = [1, 1]} : vector<8x512xf32> to vector<8x128xf32>
    %93 = arith.maximumf %91, %92 : vector<8x128xf32>
    %94 = vector.extract_strided_slice %90 {offsets = [0, 256], sizes = [8, 128], strides = [1, 1]} : vector<8x512xf32> to vector<8x128xf32>
    %95 = vector.extract_strided_slice %90 {offsets = [0, 384], sizes = [8, 128], strides = [1, 1]} : vector<8x512xf32> to vector<8x128xf32>
    %96 = arith.maximumf %94, %95 : vector<8x128xf32>
    %97 = arith.maximumf %93, %96 : vector<8x128xf32>
    %c0_106 = arith.constant 0 : index
    %c0_107 = arith.constant 0 : index
    %98 = vector.load %arg3[%c0_106, %c0_107] : memref<8x1xf32, #tpu.memory_space<vmem>>, vector<8x1xf32>
    %c0_108 = arith.constant 0 : index
    %c0_109 = arith.constant 0 : index
    %99 = vector.load %arg4[%c0_108, %c0_109] : memref<8x1xf32, #tpu.memory_space<vmem>>, vector<8x1xf32>
    %cst_110 = arith.constant dense<0.000000e+00> : vector<8xf32>
    %100 = vector.multi_reduction <add>, %97, %cst_110 [1] : vector<8x128xf32> to vector<8xf32>
    %101 = vector.shape_cast %100 : vector<8xf32> to vector<8x1xf32>
    %cst_111 = arith.constant 7.812500e-03 : f32
    %102 = vector.broadcast %cst_111 : f32 to vector<8x1xf32>
    %103 = arith.mulf %101, %102 : vector<8x1xf32>
    %104 = vector.broadcast %103 : vector<8x1xf32> to vector<8x128xf32>
    %105 = arith.subf %97, %104 : vector<8x128xf32>
    %106 = arith.mulf %105, %105 : vector<8x128xf32>
    %cst_112 = arith.constant dense<0.000000e+00> : vector<8xf32>
    %107 = vector.multi_reduction <add>, %106, %cst_112 [1] : vector<8x128xf32> to vector<8xf32>
    %108 = vector.shape_cast %107 : vector<8xf32> to vector<8x1xf32>
    %cst_113 = arith.constant 7.812500e-03 : f32
    %109 = vector.broadcast %cst_113 : f32 to vector<8x1xf32>
    %110 = arith.mulf %108, %109 : vector<8x1xf32>
    %cst_114 = arith.constant 9.99999974E-6 : f32
    %111 = vector.broadcast %cst_114 : f32 to vector<8x1xf32>
    %112 = arith.addf %110, %111 : vector<8x1xf32>
    %113 = math.rsqrt %112 : vector<8x1xf32>
    %114 = arith.mulf %98, %113 : vector<8x1xf32>
    %115 = vector.broadcast %114 : vector<8x1xf32> to vector<8x128xf32>
    %116 = arith.mulf %105, %115 : vector<8x128xf32>
    %117 = vector.broadcast %99 : vector<8x1xf32> to vector<8x128xf32>
    %118 = arith.addf %116, %117 : vector<8x128xf32>
    %cst_115 = arith.constant 0.000000e+00 : f32
    %119 = vector.broadcast %cst_115 : f32 to vector<8x128xf32>
    %120 = arith.maximumf %118, %119 : vector<8x128xf32>
    %cst_116 = arith.constant 0.000000e+00 : bf16
    %121 = vector.broadcast %cst_116 : bf16 to vector<8x128xbf16>
    %c0_117 = arith.constant 0 : index
    %c0_118 = arith.constant 0 : index
    %122 = vector.load %arg13[%c0_117, %c0_118] : memref<8x384xbf16, #tpu.memory_space<vmem>>, vector<8x128xbf16>
    tpu.vector_store %arg13[%c0_117, %c0_118], %121 {strides = array<i32>} : memref<8x384xbf16, #tpu.memory_space<vmem>>, vector<8x128xbf16>,
    %c0_119 = arith.constant 0 : index
    %c256_120 = arith.constant 256 : index
    %123 = vector.load %arg13[%c0_119, %c256_120] : memref<8x384xbf16, #tpu.memory_space<vmem>>, vector<8x128xbf16>
    tpu.vector_store %arg13[%c0_119, %c256_120], %121 {strides = array<i32>} : memref<8x384xbf16, #tpu.memory_space<vmem>>, vector<8x128xbf16>,
    %124 = arith.truncf %120 : vector<8x128xf32> to vector<8x128xbf16>
    %c0_121 = arith.constant 0 : index
    %c128_122 = arith.constant 128 : index
    %125 = vector.load %arg13[%c0_121, %c128_122] : memref<8x384xbf16, #tpu.memory_space<vmem>>, vector<8x128xbf16>
    tpu.vector_store %arg13[%c0_121, %c128_122], %124 {strides = array<i32>} : memref<8x384xbf16, #tpu.memory_space<vmem>>, vector<8x128xbf16>,
    %c0_123 = arith.constant 0 : index
    %c119_124 = arith.constant 119 : index
    %126 = vector.load %arg13[%c0_123, %c119_124] : memref<8x384xbf16, #tpu.memory_space<vmem>>, vector<8x128xbf16>
    %c0_125 = arith.constant 0 : index
    %c0_126 = arith.constant 0 : index
    %127 = vector.load %arg1[%c0_125, %c0_126] : memref<9x128xbf16, #tpu.memory_space<vmem>>, vector<1x128xbf16>
    %128 = vector.broadcast %127 : vector<1x128xbf16> to vector<8x128xbf16>
    %129 = arith.mulf %126, %128 : vector<8x128xbf16>
    %c0_127 = arith.constant 0 : index
    %c0_128 = arith.constant 0 : index
    %130 = vector.load %arg14[%c0_127, %c0_128] : memref<72x128xbf16, #tpu.memory_space<vmem>>, vector<8x128xbf16>
    tpu.vector_store %arg14[%c0_127, %c0_128], %129 {strides = array<i32>} : memref<72x128xbf16, #tpu.memory_space<vmem>>, vector<8x128xbf16>,
    %c0_129 = arith.constant 0 : index
    %c120_130 = arith.constant 120 : index
    %131 = vector.load %arg13[%c0_129, %c120_130] : memref<8x384xbf16, #tpu.memory_space<vmem>>, vector<8x128xbf16>
    %c1_131 = arith.constant 1 : index
    %c0_132 = arith.constant 0 : index
    %132 = vector.load %arg1[%c1_131, %c0_132] : memref<9x128xbf16, #tpu.memory_space<vmem>>, vector<1x128xbf16>
    %133 = vector.broadcast %132 : vector<1x128xbf16> to vector<8x128xbf16>
    %134 = arith.mulf %131, %133 : vector<8x128xbf16>
    %c8_133 = arith.constant 8 : index
    %c0_134 = arith.constant 0 : index
    %135 = vector.load %arg14[%c8_133, %c0_134] : memref<72x128xbf16, #tpu.memory_space<vmem>>, vector<8x128xbf16>
    tpu.vector_store %arg14[%c8_133, %c0_134], %134 {strides = array<i32>} : memref<72x128xbf16, #tpu.memory_space<vmem>>, vector<8x128xbf16>,
    %c0_135 = arith.constant 0 : index
    %c121_136 = arith.constant 121 : index
    %136 = vector.load %arg13[%c0_135, %c121_136] : memref<8x384xbf16, #tpu.memory_space<vmem>>, vector<8x128xbf16>
    %c2_137 = arith.constant 2 : index
    %c0_138 = arith.constant 0 : index
    %137 = vector.load %arg1[%c2_137, %c0_138] : memref<9x128xbf16, #tpu.memory_space<vmem>>, vector<1x128xbf16>
    %138 = vector.broadcast %137 : vector<1x128xbf16> to vector<8x128xbf16>
    %139 = arith.mulf %136, %138 : vector<8x128xbf16>
    %c16_139 = arith.constant 16 : index
    %c0_140 = arith.constant 0 : index
    %140 = vector.load %arg14[%c16_139, %c0_140] : memref<72x128xbf16, #tpu.memory_space<vmem>>, vector<8x128xbf16>
    tpu.vector_store %arg14[%c16_139, %c0_140], %139 {strides = array<i32>} : memref<72x128xbf16, #tpu.memory_space<vmem>>, vector<8x128xbf16>,
    %c0_141 = arith.constant 0 : index
    %c127_142 = arith.constant 127 : index
    %141 = vector.load %arg13[%c0_141, %c127_142] : memref<8x384xbf16, #tpu.memory_space<vmem>>, vector<8x128xbf16>
    %c3_143 = arith.constant 3 : index
    %c0_144 = arith.constant 0 : index
    %142 = vector.load %arg1[%c3_143, %c0_144] : memref<9x128xbf16, #tpu.memory_space<vmem>>, vector<1x128xbf16>
    %143 = vector.broadcast %142 : vector<1x128xbf16> to vector<8x128xbf16>
    %144 = arith.mulf %141, %143 : vector<8x128xbf16>
    %c24_145 = arith.constant 24 : index
    %c0_146 = arith.constant 0 : index
    %145 = vector.load %arg14[%c24_145, %c0_146] : memref<72x128xbf16, #tpu.memory_space<vmem>>, vector<8x128xbf16>
    tpu.vector_store %arg14[%c24_145, %c0_146], %144 {strides = array<i32>} : memref<72x128xbf16, #tpu.memory_space<vmem>>, vector<8x128xbf16>,
    %c0_147 = arith.constant 0 : index
    %c128_148 = arith.constant 128 : index
    %146 = vector.load %arg13[%c0_147, %c128_148] : memref<8x384xbf16, #tpu.memory_space<vmem>>, vector<8x128xbf16>
    %c32_149 = arith.constant 32 : index
    %c0_150 = arith.constant 0 : index
    %147 = vector.load %arg14[%c32_149, %c0_150] : memref<72x128xbf16, #tpu.memory_space<vmem>>, vector<8x128xbf16>
    tpu.vector_store %arg14[%c32_149, %c0_150], %146 {strides = array<i32>} : memref<72x128xbf16, #tpu.memory_space<vmem>>, vector<8x128xbf16>,
    %c0_151 = arith.constant 0 : index
    %c129_152 = arith.constant 129 : index
    %148 = vector.load %arg13[%c0_151, %c129_152] : memref<8x384xbf16, #tpu.memory_space<vmem>>, vector<8x128xbf16>
    %c5_153 = arith.constant 5 : index
    %c0_154 = arith.constant 0 : index
    %149 = vector.load %arg1[%c5_153, %c0_154] : memref<9x128xbf16, #tpu.memory_space<vmem>>, vector<1x128xbf16>
    %150 = vector.broadcast %149 : vector<1x128xbf16> to vector<8x128xbf16>
    %151 = arith.mulf %148, %150 : vector<8x128xbf16>
    %c40_155 = arith.constant 40 : index
    %c0_156 = arith.constant 0 : index
    %152 = vector.load %arg14[%c40_155, %c0_156] : memref<72x128xbf16, #tpu.memory_space<vmem>>, vector<8x128xbf16>
    tpu.vector_store %arg14[%c40_155, %c0_156], %151 {strides = array<i32>} : memref<72x128xbf16, #tpu.memory_space<vmem>>, vector<8x128xbf16>,
    %c0_157 = arith.constant 0 : index
    %c135_158 = arith.constant 135 : index
    %153 = vector.load %arg13[%c0_157, %c135_158] : memref<8x384xbf16, #tpu.memory_space<vmem>>, vector<8x128xbf16>
    %c6_159 = arith.constant 6 : index
    %c0_160 = arith.constant 0 : index
    %154 = vector.load %arg1[%c6_159, %c0_160] : memref<9x128xbf16, #tpu.memory_space<vmem>>, vector<1x128xbf16>
    %155 = vector.broadcast %154 : vector<1x128xbf16> to vector<8x128xbf16>
    %156 = arith.mulf %153, %155 : vector<8x128xbf16>
    %c48_161 = arith.constant 48 : index
    %c0_162 = arith.constant 0 : index
    %157 = vector.load %arg14[%c48_161, %c0_162] : memref<72x128xbf16, #tpu.memory_space<vmem>>, vector<8x128xbf16>
    tpu.vector_store %arg14[%c48_161, %c0_162], %156 {strides = array<i32>} : memref<72x128xbf16, #tpu.memory_space<vmem>>, vector<8x128xbf16>,
    %c0_163 = arith.constant 0 : index
    %c136_164 = arith.constant 136 : index
    %158 = vector.load %arg13[%c0_163, %c136_164] : memref<8x384xbf16, #tpu.memory_space<vmem>>, vector<8x128xbf16>
    %c7_165 = arith.constant 7 : index
    %c0_166 = arith.constant 0 : index
    %159 = vector.load %arg1[%c7_165, %c0_166] : memref<9x128xbf16, #tpu.memory_space<vmem>>, vector<1x128xbf16>
    %160 = vector.broadcast %159 : vector<1x128xbf16> to vector<8x128xbf16>
    %161 = arith.mulf %158, %160 : vector<8x128xbf16>
    %c56_167 = arith.constant 56 : index
    %c0_168 = arith.constant 0 : index
    %162 = vector.load %arg14[%c56_167, %c0_168] : memref<72x128xbf16, #tpu.memory_space<vmem>>, vector<8x128xbf16>
    tpu.vector_store %arg14[%c56_167, %c0_168], %161 {strides = array<i32>} : memref<72x128xbf16, #tpu.memory_space<vmem>>, vector<8x128xbf16>,
    %c0_169 = arith.constant 0 : index
    %c137_170 = arith.constant 137 : index
    %163 = vector.load %arg13[%c0_169, %c137_170] : memref<8x384xbf16, #tpu.memory_space<vmem>>, vector<8x128xbf16>
    %c8_171 = arith.constant 8 : index
    %c0_172 = arith.constant 0 : index
    %164 = vector.load %arg1[%c8_171, %c0_172] : memref<9x128xbf16, #tpu.memory_space<vmem>>, vector<1x128xbf16>
    %165 = vector.broadcast %164 : vector<1x128xbf16> to vector<8x128xbf16>
    %166 = arith.mulf %163, %165 : vector<8x128xbf16>
    %c64_173 = arith.constant 64 : index
    %c0_174 = arith.constant 0 : index
    %167 = vector.load %arg14[%c64_173, %c0_174] : memref<72x128xbf16, #tpu.memory_space<vmem>>, vector<8x128xbf16>
    tpu.vector_store %arg14[%c64_173, %c0_174], %166 {strides = array<i32>} : memref<72x128xbf16, #tpu.memory_space<vmem>>, vector<8x128xbf16>,
    %c0_175 = arith.constant 0 : index
    %c0_176 = arith.constant 0 : index
    %168 = vector.load %arg5[%c0_175, %c0_176] : memref<8x72xbf16, #tpu.memory_space<vmem>>, vector<8x72xbf16>
    %c0_177 = arith.constant 0 : index
    %c0_178 = arith.constant 0 : index
    %169 = vector.load %arg14[%c0_177, %c0_178] : memref<72x128xbf16, #tpu.memory_space<vmem>>, vector<72x128xbf16>
    %cst_179 = arith.constant dense<0.000000e+00> : vector<8x128xf32>
    %170 = tpu.matmul %168, %169, %cst_179 {dimension_numbers = #tpu.dot_dimension_numbers<[1], [0], [0], [1], [0, 0, 1, 1], [], []>} : vector<8x72xbf16>, vector<72x128xbf16>, vector<8x128xf32> -> vector<8x128xf32>
    %c0_180 = arith.constant 0 : index
    %c0_181 = arith.constant 0 : index
    %171 = vector.load %arg6[%c0_180, %c0_181] : memref<8x1xf32, #tpu.memory_space<vmem>>, vector<8x1xf32>
    %c0_182 = arith.constant 0 : index
    %c0_183 = arith.constant 0 : index
    %172 = vector.load %arg7[%c0_182, %c0_183] : memref<8x1xf32, #tpu.memory_space<vmem>>, vector<8x1xf32>
    %cst_184 = arith.constant dense<0.000000e+00> : vector<8xf32>
    %173 = vector.multi_reduction <add>, %170, %cst_184 [1] : vector<8x128xf32> to vector<8xf32>
    %174 = vector.shape_cast %173 : vector<8xf32> to vector<8x1xf32>
    %cst_185 = arith.constant 7.812500e-03 : f32
    %175 = vector.broadcast %cst_185 : f32 to vector<8x1xf32>
    %176 = arith.mulf %174, %175 : vector<8x1xf32>
    %177 = vector.broadcast %176 : vector<8x1xf32> to vector<8x128xf32>
    %178 = arith.subf %170, %177 : vector<8x128xf32>
    %179 = arith.mulf %178, %178 : vector<8x128xf32>
    %cst_186 = arith.constant dense<0.000000e+00> : vector<8xf32>
    %180 = vector.multi_reduction <add>, %179, %cst_186 [1] : vector<8x128xf32> to vector<8xf32>
    %181 = vector.shape_cast %180 : vector<8xf32> to vector<8x1xf32>
    %cst_187 = arith.constant 7.812500e-03 : f32
    %182 = vector.broadcast %cst_187 : f32 to vector<8x1xf32>
    %183 = arith.mulf %181, %182 : vector<8x1xf32>
    %cst_188 = arith.constant 9.99999974E-6 : f32
    %184 = vector.broadcast %cst_188 : f32 to vector<8x1xf32>
    %185 = arith.addf %183, %184 : vector<8x1xf32>
    %186 = math.rsqrt %185 : vector<8x1xf32>
    %187 = arith.mulf %171, %186 : vector<8x1xf32>
    %188 = vector.broadcast %187 : vector<8x1xf32> to vector<8x128xf32>
    %189 = arith.mulf %178, %188 : vector<8x128xf32>
    %190 = vector.broadcast %172 : vector<8x1xf32> to vector<8x128xf32>
    %191 = arith.addf %189, %190 : vector<8x128xf32>
    %cst_189 = arith.constant 0.000000e+00 : f32
    %192 = vector.broadcast %cst_189 : f32 to vector<8x128xf32>
    %193 = arith.maximumf %191, %192 : vector<8x128xf32>
    %c0_190 = arith.constant 0 : index
    %c0_191 = arith.constant 0 : index
    %194 = vector.load %arg13[%c0_190, %c0_191] : memref<8x384xbf16, #tpu.memory_space<vmem>>, vector<8x128xbf16>
    tpu.vector_store %arg13[%c0_190, %c0_191], %121 {strides = array<i32>} : memref<8x384xbf16, #tpu.memory_space<vmem>>, vector<8x128xbf16>,
    %c0_192 = arith.constant 0 : index
    %c256_193 = arith.constant 256 : index
    %195 = vector.load %arg13[%c0_192, %c256_193] : memref<8x384xbf16, #tpu.memory_space<vmem>>, vector<8x128xbf16>
    tpu.vector_store %arg13[%c0_192, %c256_193], %121 {strides = array<i32>} : memref<8x384xbf16, #tpu.memory_space<vmem>>, vector<8x128xbf16>,
    %196 = arith.truncf %193 : vector<8x128xf32> to vector<8x128xbf16>
    %c0_194 = arith.constant 0 : index
    %c128_195 = arith.constant 128 : index
    %197 = vector.load %arg13[%c0_194, %c128_195] : memref<8x384xbf16, #tpu.memory_space<vmem>>, vector<8x128xbf16>
    tpu.vector_store %arg13[%c0_194, %c128_195], %196 {strides = array<i32>} : memref<8x384xbf16, #tpu.memory_space<vmem>>, vector<8x128xbf16>,
    %c0_196 = arith.constant 0 : index
    %c119_197 = arith.constant 119 : index
    %198 = vector.load %arg13[%c0_196, %c119_197] : memref<8x384xbf16, #tpu.memory_space<vmem>>, vector<8x128xbf16>
    %c0_198 = arith.constant 0 : index
    %c0_199 = arith.constant 0 : index
    %199 = vector.load %arg1[%c0_198, %c0_199] : memref<9x128xbf16, #tpu.memory_space<vmem>>, vector<1x128xbf16>
    %200 = vector.broadcast %199 : vector<1x128xbf16> to vector<8x128xbf16>
    %201 = arith.mulf %198, %200 : vector<8x128xbf16>
    %c0_200 = arith.constant 0 : index
    %c0_201 = arith.constant 0 : index
    %202 = vector.load %arg14[%c0_200, %c0_201] : memref<72x128xbf16, #tpu.memory_space<vmem>>, vector<8x128xbf16>
    tpu.vector_store %arg14[%c0_200, %c0_201], %201 {strides = array<i32>} : memref<72x128xbf16, #tpu.memory_space<vmem>>, vector<8x128xbf16>,
    %c0_202 = arith.constant 0 : index
    %c120_203 = arith.constant 120 : index
    %203 = vector.load %arg13[%c0_202, %c120_203] : memref<8x384xbf16, #tpu.memory_space<vmem>>, vector<8x128xbf16>
    %c1_204 = arith.constant 1 : index
    %c0_205 = arith.constant 0 : index
    %204 = vector.load %arg1[%c1_204, %c0_205] : memref<9x128xbf16, #tpu.memory_space<vmem>>, vector<1x128xbf16>
    %205 = vector.broadcast %204 : vector<1x128xbf16> to vector<8x128xbf16>
    %206 = arith.mulf %203, %205 : vector<8x128xbf16>
    %c8_206 = arith.constant 8 : index
    %c0_207 = arith.constant 0 : index
    %207 = vector.load %arg14[%c8_206, %c0_207] : memref<72x128xbf16, #tpu.memory_space<vmem>>, vector<8x128xbf16>
    tpu.vector_store %arg14[%c8_206, %c0_207], %206 {strides = array<i32>} : memref<72x128xbf16, #tpu.memory_space<vmem>>, vector<8x128xbf16>,
    %c0_208 = arith.constant 0 : index
    %c121_209 = arith.constant 121 : index
    %208 = vector.load %arg13[%c0_208, %c121_209] : memref<8x384xbf16, #tpu.memory_space<vmem>>, vector<8x128xbf16>
    %c2_210 = arith.constant 2 : index
    %c0_211 = arith.constant 0 : index
    %209 = vector.load %arg1[%c2_210, %c0_211] : memref<9x128xbf16, #tpu.memory_space<vmem>>, vector<1x128xbf16>
    %210 = vector.broadcast %209 : vector<1x128xbf16> to vector<8x128xbf16>
    %211 = arith.mulf %208, %210 : vector<8x128xbf16>
    %c16_212 = arith.constant 16 : index
    %c0_213 = arith.constant 0 : index
    %212 = vector.load %arg14[%c16_212, %c0_213] : memref<72x128xbf16, #tpu.memory_space<vmem>>, vector<8x128xbf16>
    tpu.vector_store %arg14[%c16_212, %c0_213], %211 {strides = array<i32>} : memref<72x128xbf16, #tpu.memory_space<vmem>>, vector<8x128xbf16>,
    %c0_214 = arith.constant 0 : index
    %c127_215 = arith.constant 127 : index
    %213 = vector.load %arg13[%c0_214, %c127_215] : memref<8x384xbf16, #tpu.memory_space<vmem>>, vector<8x128xbf16>
    %c3_216 = arith.constant 3 : index
    %c0_217 = arith.constant 0 : index
    %214 = vector.load %arg1[%c3_216, %c0_217] : memref<9x128xbf16, #tpu.memory_space<vmem>>, vector<1x128xbf16>
    %215 = vector.broadcast %214 : vector<1x128xbf16> to vector<8x128xbf16>
    %216 = arith.mulf %213, %215 : vector<8x128xbf16>
    %c24_218 = arith.constant 24 : index
    %c0_219 = arith.constant 0 : index
    %217 = vector.load %arg14[%c24_218, %c0_219] : memref<72x128xbf16, #tpu.memory_space<vmem>>, vector<8x128xbf16>
    tpu.vector_store %arg14[%c24_218, %c0_219], %216 {strides = array<i32>} : memref<72x128xbf16, #tpu.memory_space<vmem>>, vector<8x128xbf16>,
    %c0_220 = arith.constant 0 : index
    %c128_221 = arith.constant 128 : index
    %218 = vector.load %arg13[%c0_220, %c128_221] : memref<8x384xbf16, #tpu.memory_space<vmem>>, vector<8x128xbf16>
    %c32_222 = arith.constant 32 : index
    %c0_223 = arith.constant 0 : index
    %219 = vector.load %arg14[%c32_222, %c0_223] : memref<72x128xbf16, #tpu.memory_space<vmem>>, vector<8x128xbf16>
    tpu.vector_store %arg14[%c32_222, %c0_223], %218 {strides = array<i32>} : memref<72x128xbf16, #tpu.memory_space<vmem>>, vector<8x128xbf16>,
    %c0_224 = arith.constant 0 : index
    %c129_225 = arith.constant 129 : index
    %220 = vector.load %arg13[%c0_224, %c129_225] : memref<8x384xbf16, #tpu.memory_space<vmem>>, vector<8x128xbf16>
    %c5_226 = arith.constant 5 : index
    %c0_227 = arith.constant 0 : index
    %221 = vector.load %arg1[%c5_226, %c0_227] : memref<9x128xbf16, #tpu.memory_space<vmem>>, vector<1x128xbf16>
    %222 = vector.broadcast %221 : vector<1x128xbf16> to vector<8x128xbf16>
    %223 = arith.mulf %220, %222 : vector<8x128xbf16>
    %c40_228 = arith.constant 40 : index
    %c0_229 = arith.constant 0 : index
    %224 = vector.load %arg14[%c40_228, %c0_229] : memref<72x128xbf16, #tpu.memory_space<vmem>>, vector<8x128xbf16>
    tpu.vector_store %arg14[%c40_228, %c0_229], %223 {strides = array<i32>} : memref<72x128xbf16, #tpu.memory_space<vmem>>, vector<8x128xbf16>,
    %c0_230 = arith.constant 0 : index
    %c135_231 = arith.constant 135 : index
    %225 = vector.load %arg13[%c0_230, %c135_231] : memref<8x384xbf16, #tpu.memory_space<vmem>>, vector<8x128xbf16>
    %c6_232 = arith.constant 6 : index
    %c0_233 = arith.constant 0 : index
    %226 = vector.load %arg1[%c6_232, %c0_233] : memref<9x128xbf16, #tpu.memory_space<vmem>>, vector<1x128xbf16>
    %227 = vector.broadcast %226 : vector<1x128xbf16> to vector<8x128xbf16>
    %228 = arith.mulf %225, %227 : vector<8x128xbf16>
    %c48_234 = arith.constant 48 : index
    %c0_235 = arith.constant 0 : index
    %229 = vector.load %arg14[%c48_234, %c0_235] : memref<72x128xbf16, #tpu.memory_space<vmem>>, vector<8x128xbf16>
    tpu.vector_store %arg14[%c48_234, %c0_235], %228 {strides = array<i32>} : memref<72x128xbf16, #tpu.memory_space<vmem>>, vector<8x128xbf16>,
    %c0_236 = arith.constant 0 : index
    %c136_237 = arith.constant 136 : index
    %230 = vector.load %arg13[%c0_236, %c136_237] : memref<8x384xbf16, #tpu.memory_space<vmem>>, vector<8x128xbf16>
    %c7_238 = arith.constant 7 : index
    %c0_239 = arith.constant 0 : index
    %231 = vector.load %arg1[%c7_238, %c0_239] : memref<9x128xbf16, #tpu.memory_space<vmem>>, vector<1x128xbf16>
    %232 = vector.broadcast %231 : vector<1x128xbf16> to vector<8x128xbf16>
    %233 = arith.mulf %230, %232 : vector<8x128xbf16>
    %c56_240 = arith.constant 56 : index
    %c0_241 = arith.constant 0 : index
    %234 = vector.load %arg14[%c56_240, %c0_241] : memref<72x128xbf16, #tpu.memory_space<vmem>>, vector<8x128xbf16>
    tpu.vector_store %arg14[%c56_240, %c0_241], %233 {strides = array<i32>} : memref<72x128xbf16, #tpu.memory_space<vmem>>, vector<8x128xbf16>,
    %c0_242 = arith.constant 0 : index
    %c137_243 = arith.constant 137 : index
    %235 = vector.load %arg13[%c0_242, %c137_243] : memref<8x384xbf16, #tpu.memory_space<vmem>>, vector<8x128xbf16>
    %c8_244 = arith.constant 8 : index
    %c0_245 = arith.constant 0 : index
    %236 = vector.load %arg1[%c8_244, %c0_245] : memref<9x128xbf16, #tpu.memory_space<vmem>>, vector<1x128xbf16>
    %237 = vector.broadcast %236 : vector<1x128xbf16> to vector<8x128xbf16>
    %238 = arith.mulf %235, %237 : vector<8x128xbf16>
    %c64_246 = arith.constant 64 : index
    %c0_247 = arith.constant 0 : index
    %239 = vector.load %arg14[%c64_246, %c0_247] : memref<72x128xbf16, #tpu.memory_space<vmem>>, vector<8x128xbf16>
    tpu.vector_store %arg14[%c64_246, %c0_247], %238 {strides = array<i32>} : memref<72x128xbf16, #tpu.memory_space<vmem>>, vector<8x128xbf16>,
    %c0_248 = arith.constant 0 : index
    %c0_249 = arith.constant 0 : index
    %240 = vector.load %arg8[%c0_248, %c0_249] : memref<8x72xbf16, #tpu.memory_space<vmem>>, vector<8x72xbf16>
    %c0_250 = arith.constant 0 : index
    %c0_251 = arith.constant 0 : index
    %241 = vector.load %arg14[%c0_250, %c0_251] : memref<72x128xbf16, #tpu.memory_space<vmem>>, vector<72x128xbf16>
    %cst_252 = arith.constant dense<0.000000e+00> : vector<8x128xf32>
    %242 = tpu.matmul %240, %241, %cst_252 {dimension_numbers = #tpu.dot_dimension_numbers<[1], [0], [0], [1], [0, 0, 1, 1], [], []>} : vector<8x72xbf16>, vector<72x128xbf16>, vector<8x128xf32> -> vector<8x128xf32>
    %c0_253 = arith.constant 0 : index
    %c0_254 = arith.constant 0 : index
    %243 = vector.load %arg9[%c0_253, %c0_254] : memref<8x1xf32, #tpu.memory_space<vmem>>, vector<8x1xf32>
    %c0_255 = arith.constant 0 : index
    %c0_256 = arith.constant 0 : index
    %244 = vector.load %arg10[%c0_255, %c0_256] : memref<8x1xf32, #tpu.memory_space<vmem>>, vector<8x1xf32>
    %cst_257 = arith.constant dense<0.000000e+00> : vector<8xf32>
    %245 = vector.multi_reduction <add>, %242, %cst_257 [1] : vector<8x128xf32> to vector<8xf32>
    %246 = vector.shape_cast %245 : vector<8xf32> to vector<8x1xf32>
    %cst_258 = arith.constant 7.812500e-03 : f32
    %247 = vector.broadcast %cst_258 : f32 to vector<8x1xf32>
    %248 = arith.mulf %246, %247 : vector<8x1xf32>
    %249 = vector.broadcast %248 : vector<8x1xf32> to vector<8x128xf32>
    %250 = arith.subf %242, %249 : vector<8x128xf32>
    %251 = arith.mulf %250, %250 : vector<8x128xf32>
    %cst_259 = arith.constant dense<0.000000e+00> : vector<8xf32>
    %252 = vector.multi_reduction <add>, %251, %cst_259 [1] : vector<8x128xf32> to vector<8xf32>
    %253 = vector.shape_cast %252 : vector<8xf32> to vector<8x1xf32>
    %cst_260 = arith.constant 7.812500e-03 : f32
    %254 = vector.broadcast %cst_260 : f32 to vector<8x1xf32>
    %255 = arith.mulf %253, %254 : vector<8x1xf32>
    %cst_261 = arith.constant 9.99999974E-6 : f32
    %256 = vector.broadcast %cst_261 : f32 to vector<8x1xf32>
    %257 = arith.addf %255, %256 : vector<8x1xf32>
    %258 = math.rsqrt %257 : vector<8x1xf32>
    %259 = arith.mulf %243, %258 : vector<8x1xf32>
    %260 = vector.broadcast %259 : vector<8x1xf32> to vector<8x128xf32>
    %261 = arith.mulf %250, %260 : vector<8x128xf32>
    %262 = vector.broadcast %244 : vector<8x1xf32> to vector<8x128xf32>
    %263 = arith.addf %261, %262 : vector<8x128xf32>
    %cst_262 = arith.constant 0.000000e+00 : f32
    %264 = vector.broadcast %cst_262 : f32 to vector<8x128xf32>
    %265 = arith.maximumf %263, %264 : vector<8x128xf32>
    %266 = arith.addf %120, %265 : vector<8x128xf32>
    %c0_263 = arith.constant 0 : index
    %c0_264 = arith.constant 0 : index
    %267 = vector.load %arg11[%c0_263, %c0_264] : memref<8x128xf32, #tpu.memory_space<vmem>>, vector<8x128xf32>
    tpu.vector_store %arg11[%c0_263, %c0_264], %266 {strides = array<i32>} : memref<8x128xf32, #tpu.memory_space<vmem>>, vector<8x128xf32>,
    return
  }
}

</mosaic_0001>

<bundles_post_ra>
// kernel: layer_forward.1
= control target key start
LH: loop header
LB: loop body
LE: loop exit
PB: predicated region body
PF: predicated region fallthrough
CT: control target
= control target key end

     0   :  { %v44_v0 = vlaneseq  ;;  %s1425_s16 = smov 119   ;;  %s1426_s17 = smov 120   ;;  %vm54_vm0 = vcmask 973824   ;;  %vm82_vm1 = vcmask 982016   ;;  %vm136_vm2 = vcmask 1039360   ;;  %s1828_s1 = inlined_call_operand.vmem [shape: bf16[9,128], index: 1, kind: input, shape index: {}]   ;;  %s1829_s0 = inlined_call_operand.vmem [shape: bf16[32,384], index: 0, kind: input, shape index: {}]   ;;  %s1830_s2 = inlined_call_operand.vmem [shape: bf16[8,72], index: 2, kind: input, shape index: {}]   ;;  %s1831_s4 = inlined_call_operand.vmem [shape: f32[8,1], index: 4, kind: input, shape index: {}]   ;;  %s1832_s3 = inlined_call_operand.vmem [shape: f32[8,1], index: 3, kind: input, shape index: {}]   ;;  %s1833_s5 = inlined_call_operand.vmem [shape: bf16[8,72], index: 5, kind: input, shape index: {}]   ;;  %s1834_s7 = inlined_call_operand.vmem [shape: f32[8,1], index: 7, kind: input, shape index: {}]   ;;  %s1835_s6 = inlined_call_operand.vmem [shape: f32[8,1], index: 6, kind: input, shape index: {}]   ;;  %s1836_s8 = inlined_call_operand.vmem [shape: bf16[8,72], index: 8, kind: input, shape index: {}]   ;;  %s1837_s10 = inlined_call_operand.vmem [shape: f32[8,1], index: 10, kind: input, shape index: {}]   ;;  %s1838_s9 = inlined_call_operand.vmem [shape: f32[8,1], index: 9, kind: input, shape index: {}]   ;;  %s1839_s11 = inlined_call_operand.vmem [shape: f32[8,128], index: 11, kind: output, shape index: {}]  }
   0x1   :  { %v40_v1 = vld [vmem:[%s1828_s1] sm:$0x1]  ;;  %v121_v8 = vld [vmem:[%s1828_s1] sm:$0x2]  ;;  %v214_v16 = vld [vmem:[%s1828_s1] sm:$0x4] }
   0x2   :  { %v95_v2 = vld [vmem:[%s1828_s1] sm:$0x1]  ;;  %v42_v4 = vpack.i.b16 %v40_v1, %v40_v1  ;;  %v45_v5 = vshrl.u32 %v44_v0, 7  ;;  %v123_v9 = vshrl.u32 %v121_v8, 16  ;;  %v153_v10 = vld [vmem:[%s1828_s1] sm:$0x2] }
   0x3   :  { %v67_v3 = vld [vmem:[%s1828_s1] sm:$0x1]  ;;  %v97_v6 = vshrl.u32 %v95_v2, 16  ;;  %v185_v11 = vld [vmem:[%s1828_s1] sm:$0x2]  ;;  %v155_v18 = vshrl.u32 %v153_v10, 16 }
   0x4   :  { %v69_v7 = vshrl.u32 %v67_v3, 16  ;;  %v1514_v12 = vsub.s32 0, %v45_v5  ;;  %v1516_v15 = vsub.s32 1, %v45_v5  ;;  %v124_v17 = vpack.i.b16 %v123_v9, %v123_v9  ;;  %v242_v21 = vld [vmem:[%s1828_s1] sm:$0x4]  ;;  %s1427_s22 = smov 127  }
   0x5   :  { %v98_v13 = vpack.i.b16 %v97_v6, %v97_v6  ;;  %v187_v19 = vpack.i.b16 %v185_v11, %v185_v11  ;;  %v216_v20 = vshrl.u32 %v214_v16, 16  ;;  %v156_v26 = vpack.i.b16 %v155_v18, %v155_v18  ;;  %v299_v27 = vld [vmem:[%s1828_s1] sm:$0x8]  ;;  %v359_v49 = vld [vmem:[%s1828_s1 + $0x4] sm:$0x1]  ;;  %s1428_s25 = smov 121  }
   0x6   :  { %v70_v14 = vpack.i.b16 %v69_v7, %v69_v7  ;;  %v47_v22 = vrot.slane %v42_v4, %v1514_v12  ;;  %v129_v25 = vrot.slane %v124_v17, %v1516_v15  ;;  %v244_v30 = vshrl.u32 %v242_v21, 16  ;;  %v274_v38 = vld [vmem:[%s1828_s1] sm:$0x8]  ;;  %s1429_s26 = smov 1   ;;  %s1430_s27 = smov 7   ;;  %v39_v0 = vld [vmem:[%s1829_s0 + $0x24] sm:$0xff] }
   0x7   :  { %v103_v23 = vrot.slane %v98_v13, %v1514_v12  ;;  %v192_v32 = vrot.slane %v187_v19, %v1516_v15  ;;  %v217_v33 = vpack.i.b16 %v216_v20, %v216_v20  ;;  %v1532_v34 = vsub.s32 2, %v45_v5  ;;  %v325_v40 = vld [vmem:[%s1828_s1] sm:$0x8]  ;;  %s1431_s28 = smov 8   ;;  %s1432_s29 = smov 9   ;;  %v66_v11 = vld [vmem:[%s1829_s0 + $0x18] sm:$0xff] }
   0x8   :  { %v75_v24 = vrot.slane %v70_v14, %v1514_v12  ;;  %v1264_v28 = vcombine.low %v47_v22, %v47_v22  ;;  %v1267_v35 = vcombine.low %v129_v25, %v129_v25  ;;  %v161_v36 = vrot.slane %v156_v26, %v1516_v15  ;;  %v148_v7 = vld [vmem:[%s1829_s0 + $0x4] sm:$0xf]  ;;  %v150_v8 = vld [vmem:[%s1829_s0 + $0x10] sm:$0xf]  ;;  %v178_v9 = vld [vmem:[%s1829_s0 + $0x1c] sm:$0xf] }
   0x9   :  { %v1266_v29 = vcombine.low %v103_v23, %v103_v23  ;;  %v245_v37 = vpack.i.b16 %v244_v30, %v244_v30  ;;  %v301_v39 = vshrl.u32 %v299_v27, 16  ;;  %v1269_v41 = vcombine.low %v192_v32, %v192_v32  ;;  %268 = vst [vmem:[#allocation2 + $0x18] sm:$0xf] %v148_v7  ;;  %350 = vst [vmem:[#allocation2 + $0xc] sm:$0xf] %v148_v7  ;;  %v120_v22 = vld [vmem:[%s1829_s0 + $0xc] sm:$0xff] }
   0xa   :  { %v1265_v31 = vcombine.low %v75_v24, %v75_v24  ;;  %51 = vrot.lane.b32.xlu0 %v1264_v28, %s1425_s16  ;;  %v222_v42 = vrot.slane %v217_v33, %v1532_v34  ;;  %v276_v43 = vpack.i.b16 %v274_v38, %v274_v38  ;;  %v1544_v44 = vsub.s32 3, %v45_v5  ;;  %351 = vst [vmem:[#allocation2 + $0x1c] sm:$0xf] %v150_v8  ;;  %v180_v16 = vld [vmem:[%s1829_s0 + $0x28] sm:$0xf] }
   0xb   :  { %107 = vrot.lane.b32.xlu1 %v1266_v29, %s1426_s17  ;;  %v1268_v45 = vcombine.low %v161_v36, %v161_v36  ;;  %v250_v46 = vrot.slane %v245_v37, %v1532_v34  ;;  %v302_v47 = vpack.i.b16 %v301_v39, %v301_v39  ;;  %v327_v48 = vshrl.u32 %v325_v40, 16  ;;  %149 = vst [vmem:[#allocation2 + $0x40] sm:$0xf] %v148_v7  ;;  %v213_v32 = vld [vmem:[%s1829_s0 + $0x4] sm:$0xff] }
   0xc   :  { %v1270_v50 = vcombine.low %v222_v42, %v222_v42  ;;  %v281_v51 = vrot.slane %v276_v43, %v1544_v44  ;;  %v361_v52 = vpack.i.b16 %v359_v49, %v359_v49  ;;  %151 = vst [vmem:[#allocation2 + $0x50] sm:$0xf] %v150_v8  ;;  %211 = vst [vmem:[#allocation2 + $0x34] sm:$0xf] %v148_v7  ;;  %vm199_vm3 = vcmask 990208   ;;  %v273_v43 = vld [vmem:[%s1829_s0 + $0x10] sm:$0xff] }
   0xd   :  { %v1271_v53 = vcombine.low %v250_v46, %v250_v46  ;;  %v307_v54 = vrot.slane %v302_v47, %v1544_v44  ;;  %v328_v55 = vpack.i.b16 %v327_v48, %v327_v48  ;;  %212 = vst [vmem:[#allocation2 + $0x44] sm:$0xf] %v150_v8  ;;  %269 = vst [vmem:[#allocation2 + $0x28] sm:$0xf] %v150_v8  ;;  %vm144_vm4 = vcmask 7168  }
   0xe   :  { %79 = vrot.lane.b32.xlu0 %v1265_v31, %s1426_s17  ;;  %v366_v56 = vrot.slane %v361_v52, %v1514_v12  ;;  %v1272_v57 = vcombine.low %v281_v51, %v281_v51  ;;  %353 = vst [vmem:[#allocation2 + $0x3c] sm:$0xf] %v178_v9  ;;  %179 = vst [vmem:[#allocation2 + $0x70] sm:$0xf] %v178_v9  ;;  %vm207_vm5 = vcmask 56320   ;;  %vm90_vm6 = vcmask 64512  }
   0xf   :  { %133 = vrot.lane.b32.xlu1 %v1267_v35, %s1427_s22  ;;  %v1273_v58 = vcombine.low %v307_v54, %v307_v54  ;;  %v333_v59 = vrot.slane %v328_v55, %v1544_v44  ;;  %239 = vst [vmem:[#allocation2 + $0x64] sm:$0xf] %v178_v9  ;;  %271 = vst [vmem:[#allocation2 + $0x48] sm:$0xf] %v178_v9  ;;  %vm62_vm7 = vcmask 72704   ;;  %vm496_vm8 = vcmask 1043456  }
  0x10   :  { %v1275_v61 = vcombine.low %v366_v56, %v366_v56  ;;  %272 = vst [vmem:[#allocation2 + $0x58] sm:$0xf] %v180_v16  ;;  %354 = vst [vmem:[#allocation2 + $0x4c] sm:$0xf] %v180_v16  ;;  %vm492_vm9 = vcmask 588800   ;;  %vm1435_vm10 = vmmov 0  }
  0x11   :  { %v1274_v60 = vcombine.low %v333_v59, %v333_v59  ;;  %181 = vst [vmem:[#allocation2 + $0x80] sm:$0xf] %v180_v16  ;;  %240 = vst [vmem:[#allocation2 + $0x74] sm:$0xf] %v180_v16 }
  0x12   :  { %165 = vrot.lane.b32.xlu0 %v1268_v45, %s1427_s22 }
  0x13   :  { %196 = vrot.lane.b32.xlu1 %v1269_v41, %s1428_s25  ;;  %v241_v41 = vld [vmem:[%s1829_s0 + $0x1c] sm:$0xff] }
  0x16   :  { %226 = vrot.lane.b32.xlu0 %v1270_v50, %s1429_s26 }
  0x17   :  { %254 = vrot.lane.b32.xlu1 %v1271_v53, %s1429_s26 }
  0x1a   :  { %285 = vrot.lane.b32.xlu0 %v1272_v57, %s1430_s27 }
  0x1b   :  { %311 = vrot.lane.b32.xlu1 %v1273_v58, %s1431_s28 }
  0x1e   :  { %337 = vrot.lane.b32.xlu0 %v1274_v60, %s1431_s28  ;;  %v1433_v60 = vmov 0  }
  0x1f   :  { %370 = vrot.lane.b32.xlu1 %v1275_v61, %s1432_s29  ;;  %541 = vmatprep.mubr.bf16.mxu0 %v1433_v60  ;;  %620 = vst [vmem:[#allocation3] sm:$0xf] %v1433_v60  ;;  %621 = vst [vmem:[#allocation3 + $0x8] sm:$0xf] %v1433_v60 }
  0x20   :  { %582 = vmatprep.mubr.bf16.mxu1 %v1433_v60  ;;  %1380 = vset.pattern.permute.xlu1 %v1433_v60 }
  0x21   :  { %1379 = vset.pattern.permute.xlu0 %v1433_v60 }
  0x7c   :  { %v52_v62 = vpop.permute.xlu0 %51 }
  0x7d   :  { %v108_v63 = vpop.permute.xlu1 %107  ;;  %v53_v1 = vrot.slane %v52_v62, 4 }
  0x7e   :  { %v109_v2 = vrot.slane %v108_v63, 4 }
  0x7f   :  { %v55_v3 = vsel %vm54_vm0, %v53_v1, %v52_v62 }
  0x80   :  { %v57_v4 = vmul.bf16 %v55_v3, %v39_v0  ;;  %v80_v5 = vpop.permute.xlu0 %79  ;;  %v110_v10 = vsel %vm82_vm1, %v109_v2, %v108_v63 }
  0x81   :  { %v134_v6 = vpop.permute.xlu1 %133  ;;  %v81_v13 = vrot.slane %v80_v5, 4  ;;  %v112_v18 = vmul.bf16 %v110_v10, %v39_v0 }
  0x82   :  { %v135_v14 = vrot.slane %v134_v6, 4  ;;  %59 = vrot.lane.b32.xlu0 %v57_v4, %s1432_s29 }
  0x83   :  { %v83_v17 = vsel %vm82_vm1, %v81_v13, %v80_v5 }
  0x84   :  { %v85_v19 = vmul.bf16 %v83_v17, %v66_v11  ;;  %v166_v20 = vpop.permute.xlu0 %165  ;;  %v137_v23 = vsel %vm136_vm2, %v135_v14, %v134_v6 }
  0x85   :  { %v197_v21 = vpop.permute.xlu1 %196  ;;  %v167_v24 = vrot.slane %v166_v20, 4  ;;  %v139_v27 = vmul.bf16 %v137_v23, %v120_v22 }
  0x86   :  { %v198_v25 = vrot.slane %v197_v21, 4  ;;  %87 = vrot.lane.b32.xlu1 %v85_v19, %s1431_s28  ;;  %114 = vrot.lane.b32.xlu0 %v112_v18, %s1431_s28 }
  0x87   :  { %v168_v26 = vsel %vm136_vm2, %v167_v24, %v166_v20 }
  0x88   :  { %v170_v28 = vmul.bf16 %v168_v26, %v39_v0  ;;  %v227_v29 = vpop.permute.xlu0 %226  ;;  %v200_v31 = vsel %vm199_vm3, %v198_v25, %v197_v21 }
  0x89   :  { %v255_v30 = vpop.permute.xlu1 %254  ;;  %v228_v33 = vrot.slane %v227_v29, 4  ;;  %v202_v37 = vmul.bf16 %v200_v31, %v66_v11 }
  0x8a   :  { %v256_v35 = vrot.slane %v255_v30, 4  ;;  %141 = vrot.lane.b32.xlu1 %v139_v27, %s1429_s26  ;;  %172 = vrot.lane.b32.xlu0 %v170_v28, %s1429_s26  ;;  %v1384_v28 = vld [vmem:[#allocation2 + $0xc] ss:$16 sps:$4 sm:$0xff]  }
  0x8b   :  { %v229_v36 = vsel %vm144_vm4, %v228_v33, %v227_v29  ;;  %550 = vmatprep.subr.bf16.mxu1 %v1384_v28 }
  0x8c   :  { %v231_v38 = vmul.bf16 %v229_v36, %v213_v32  ;;  %v286_v39 = vpop.permute.xlu0 %285  ;;  %v257_v42 = vsel %vm144_vm4, %v256_v35, %v255_v30 }
  0x8d   :  { %v312_v40 = vpop.permute.xlu1 %311  ;;  %v287_v45 = vrot.slane %v286_v39, 4  ;;  %v259_v48 = vmul.bf16 %v257_v42, %v241_v41 }
  0x8e   :  { %v313_v46 = vrot.slane %v312_v40, 4  ;;  %204 = vrot.lane.b32.xlu1 %v202_v37, %s1430_s27  ;;  %233 = vrot.lane.b32.xlu0 %v231_v38, %s1427_s22 }
  0x8f   :  { %v288_v47 = vsel %vm207_vm5, %v287_v45, %v286_v39 }
  0x90   :  { %v290_v49 = vmul.bf16 %v288_v47, %v273_v43  ;;  %v338_v50 = vpop.permute.xlu0 %337  ;;  %v314_v52 = vsel %vm90_vm6, %v313_v46, %v312_v40  ;;  %v1398_v47 = vld [vmem:[#allocation2 + $0x48] ss:$16 sps:$4 sm:$0xff]  }
  0x91   :  { %v371_v51 = vpop.permute.xlu1 %370  ;;  %v339_v53 = vrot.slane %v338_v50, 4  ;;  %v316_v56 = vmul.bf16 %v314_v52, %v213_v32 }
  0x92   :  { %v372_v54 = vrot.slane %v371_v51, 4  ;;  %261 = vrot.lane.b32.xlu1 %v259_v48, %s1427_s22  ;;  %292 = vrot.lane.b32.xlu0 %v290_v49, %s1428_s25  ;;  %v1397_v48 = vld [vmem:[#allocation2 + $0x40] ss:$16 sps:$4 sm:$0xff]   ;;  %v1399_v49 = vld [vmem:[#allocation2 + $0x64] ss:$16 sps:$4 sm:$0xff]  }
  0x93   :  { %v340_v55 = vsel %vm90_vm6, %v339_v53, %v338_v50 }
  0x94   :  { %v342_v57 = vmul.bf16 %v340_v55, %v273_v43  ;;  %v373_v58 = vsel %vm62_vm7, %v372_v54, %v371_v51 }
  0x95   :  { %v375_v59 = vmul.bf16 %v373_v58, %v213_v32 }
  0x96   :  { %318 = vrot.lane.b32.xlu1 %v316_v56, %s1426_s17  ;;  %344 = vrot.lane.b32.xlu0 %v342_v57, %s1426_s17 }
  0x9a   :  { %377 = vrot.lane.b32.xlu1 %v375_v59, %s1425_s16 }
  0xf4   :  { %v60_v61 = vpop.permute.xlu0 %59 }
  0xf5   :  { %v61_v62 = vrot.slane %v60_v61, 4 }
  0xf7   :  { %v63_v63 = vsel %vm62_vm7, %v60_v61, %v61_v62  ;;  %v383_v62 = vld [vmem:[%s1830_s2] sm:$0xf] }
  0xf8   :  { %65 = vst [vmem:[#allocation2] sm:$0xf] %v63_v63  ;;  %v88_v0 = vpop.permute.xlu1 %87  ;;  %v115_v1 = vpop.permute.xlu0 %114 }
  0xf9   :  { %v89_v2 = vrot.slane %v88_v0, 4  ;;  %v116_v3 = vrot.slane %v115_v1, 4 }
  0xfb   :  { %v91_v4 = vsel %vm90_vm6, %v88_v0, %v89_v2  ;;  %v117_v5 = vsel %vm90_vm6, %v115_v1, %v116_v3 }
  0xfc   :  { %93 = vst [vmem:[#allocation2 + $0x10] sm:$0xf] %v91_v4  ;;  %182 = vst [vmem:[#allocation2 + $0x4] sm:$0xf] %v91_v4  ;;  %v142_v6 = vpop.permute.xlu1 %141  ;;  %v173_v7 = vpop.permute.xlu0 %172 }
  0xfd   :  { %119 = vst [vmem:[#allocation2 + $0x20] sm:$0xf] %v117_v5  ;;  %183 = vst [vmem:[#allocation2 + $0x14] sm:$0xf] %v117_v5  ;;  %v143_v8 = vrot.slane %v142_v6, 4  ;;  %v174_v9 = vrot.slane %v173_v7, 4 }
  0xff   :  { %v145_v10 = vsel %vm144_vm4, %v142_v6, %v143_v8  ;;  %v175_v11 = vsel %vm144_vm4, %v173_v7, %v174_v9 }
 0x100   :  { %147 = vst [vmem:[#allocation2 + $0x30] sm:$0xf] %v145_v10  ;;  %267 = vst [vmem:[#allocation2 + $0x8] sm:$0xf] %v145_v10  ;;  %v205_v13 = vpop.permute.xlu1 %204  ;;  %v234_v14 = vpop.permute.xlu0 %233 }
 0x101   :  { %177 = vst [vmem:[#allocation2 + $0x60] sm:$0xf] %v175_v11  ;;  %270 = vst [vmem:[#allocation2 + $0x38] sm:$0xf] %v175_v11  ;;  %v206_v16 = vrot.slane %v205_v13, 4  ;;  %v235_v17 = vrot.slane %v234_v14, 4 }
 0x103   :  { %v208_v18 = vsel %vm207_vm5, %v205_v13, %v206_v16  ;;  %v236_v19 = vsel %vm136_vm2, %v234_v14, %v235_v17  ;;  %v1383_v23 = vld [vmem:[#allocation2] ss:$16 sps:$4 sm:$0xff]  }
 0x104   :  { %v1381_v20 = vld [vmem:[#allocation2 + $0x4] ss:$16 sps:$4 sm:$0xff]   ;;  %210 = vst [vmem:[#allocation2 + $0x24] sm:$0xf] %v208_v18  ;;  %238 = vst [vmem:[#allocation2 + $0x54] sm:$0xf] %v236_v19  ;;  %v262_v21 = vpop.permute.xlu1 %261  ;;  %v293_v22 = vpop.permute.xlu0 %292 }
 0x105   :  { %352 = vst [vmem:[#allocation2 + $0x2c] sm:$0xf] %v236_v19  ;;  %v263_v24 = vrot.slane %v262_v21, 4  ;;  %v294_v25 = vrot.slane %v293_v22, 4  ;;  %509 = vmatprep.subr.bf16.mxu0 %v1381_v20  ;;  %v595_v16 = vld [vmem:[%s1831_s4] sm:$0xff] }
 0x106   :  { %510 = vmatpush1.bf16.msra.mxu0 %v1383_v23  ;;  %v625_v17 = vld [vmem:[%s1828_s1] sm:$0x1]  ;;  %v701_v23 = vld [vmem:[%s1828_s1] sm:$0x2] }
 0x107   :  { %v264_v26 = vsel %vm136_vm2, %v262_v21, %v263_v24  ;;  %v295_v27 = vsel %vm199_vm3, %v293_v22, %v294_v25  ;;  %v1386_v29 = vld [vmem:[#allocation2 + $0x8] ss:$16 sps:$4 sm:$0xff]   ;;  %v1391_v40 = vld [vmem:[#allocation2 + $0x20] ss:$16 sps:$4 sm:$0xff]   ;;  %v627_v18 = vpack.i.b16 %v625_v17, %v625_v17  ;;  %v703_v25 = vshrl.u32 %v701_v23, 16 }
 0x108   :  { %266 = vst [vmem:[#allocation2 + $0x84] sm:$0xf] %v264_v26  ;;  %355 = vst [vmem:[#allocation2 + $0x5c] sm:$0xf] %v264_v26  ;;  %v319_v30 = vpop.permute.xlu1 %318  ;;  %v345_v31 = vpop.permute.xlu0 %344  ;;  %551 = vmatpush1.bf16.msra.mxu1 %v1386_v29  ;;  %v1392_v41 = vld [vmem:[#allocation2 + $0x28] ss:$16 sps:$4 sm:$0xff]  }
 0x109   :  { %297 = vst [vmem:[#allocation2 + $0x68] sm:$0xf] %v295_v27  ;;  %v320_v32 = vrot.slane %v319_v30, 4  ;;  %v346_v33 = vrot.slane %v345_v31, 4  ;;  %v1403_v52 = vld [vmem:[#allocation2 + $0x60] ss:$16 sps:$4 sm:$0xff]   ;;  %v632_v20 = vrot.slane %v627_v18, %v1514_v12 }
 0x10a   :  { %v650_v19 = vld [vmem:[%s1828_s1] sm:$0x1]  ;;  %v676_v22 = vld [vmem:[%s1828_s1] sm:$0x2]  ;;  %v729_v26 = vld [vmem:[%s1828_s1] sm:$0x4] }
 0x10b   :  { %v321_v35 = vsel %vm82_vm1, %v319_v30, %v320_v32  ;;  %v347_v36 = vsel %vm82_vm1, %v345_v31, %v346_v33  ;;  %v1387_v37 = vld [vmem:[#allocation2 + $0x24] ss:$16 sps:$4 sm:$0xff]   ;;  %v652_v21 = vshrl.u32 %v650_v19, 16  ;;  %v678_v24 = vpack.i.b16 %v676_v22, %v676_v22 }
 0x10c   :  { %323 = vst [vmem:[#allocation2 + $0x78] sm:$0xf] %v321_v35  ;;  %356 = vst [vmem:[#allocation2 + $0x6c] sm:$0xf] %v321_v35  ;;  %v378_v38 = vpop.permute.xlu1 %377  ;;  %v1389_v39 = vld [vmem:[#allocation2 + $0x2c] ss:$16 sps:$4 sm:$0xff]   ;;  %511 = vmatprep.subr.bf16.mxu0 %v1387_v37  ;;  %v1300_v27 = vcombine.low %v632_v20, %v632_v20  ;;  %v704_v31 = vpack.i.b16 %v703_v25, %v703_v25 }
 0x10d   :  { %349 = vst [vmem:[#allocation2 + $0x88] sm:$0xf] %v347_v36  ;;  %357 = vst [vmem:[#allocation2 + $0x7c] sm:$0xf] %v347_v36  ;;  %v379_v42 = vrot.slane %v378_v38, 4  ;;  %552 = vmatprep.subr.bf16.mxu1 %v1389_v39  ;;  %512 = vmatpush1.bf16.msra.mxu0 %v1391_v40  ;;  %v653_v28 = vpack.i.b16 %v652_v21, %v652_v21  ;;  %v683_v30 = vrot.slane %v678_v24, %v1516_v15 }
 0x10e   :  { %v1393_v43 = vld [vmem:[#allocation2 + $0x44] ss:$16 sps:$4 sm:$0xff]   ;;  %553 = vmatpush1.bf16.msra.mxu1 %v1392_v41  ;;  %v731_v32 = vshrl.u32 %v729_v26, 16  ;;  %v709_v36 = vrot.slane %v704_v31, %v1516_v15 }
 0x10f   :  { %v380_v45 = vsel %vm54_vm0, %v378_v38, %v379_v42  ;;  %513 = vmatprep.subr.bf16.mxu0 %v1393_v43  ;;  %v1395_v46 = vld [vmem:[#allocation2 + $0x4c] ss:$16 sps:$4 sm:$0xff]   ;;  %v400_v50 = vld [vmem:[#allocation2 + $0x80] sm:$0xff]  ;;  %v658_v29 = vrot.slane %v653_v28, %v1514_v12  ;;  %v1302_v35 = vcombine.low %v683_v30, %v683_v30 }
 0x110   :  { %382 = vst [vmem:[#allocation2 + $0x8c] sm:$0xf] %v380_v45  ;;  %554 = vmatprep.subr.bf16.mxu1 %v1395_v46  ;;  %v1293_v54 = vcombine.high %v400_v50, %v400_v50  ;;  %v1292_v55 = vcombine.low %v400_v50, %v400_v50  ;;  %v732_v37 = vpack.i.b16 %v731_v32, %v731_v32  ;;  %v755_v38 = vld [vmem:[%s1828_s1] sm:$0x8]  ;;  %v806_v42 = vld [vmem:[%s1828_s1 + $0x4] sm:$0x1] }
 0x111   :  { %514 = vmatpush1.bf16.msra.mxu0 %v1397_v48  ;;  %v1301_v33 = vcombine.low %v658_v29, %v658_v29  ;;  %v1303_v39 = vcombine.low %v709_v36, %v709_v36  ;;  %v757_v41 = vpack.i.b16 %v755_v38, %v755_v38  ;;  %v808_v46 = vpack.i.b16 %v806_v42, %v806_v42 }
 0x112   :  { %555 = vmatpush1.bf16.msra.mxu1 %v1398_v47  ;;  %515 = vmatprep.subr.bf16.mxu0 %v1399_v49  ;;  %v498_v59 = vsel %vm496_vm8, %v1292_v55, 0  ;;  %v737_v40 = vrot.slane %v732_v37, %v1532_v34  ;;  %v1434_v29 = vmov 0.0  }
 0x113   :  { %v1404_v53 = vld [vmem:[#allocation2 + $0x68] ss:$16 sps:$4 sm:$0xff]   ;;  %v762_v45 = vrot.slane %v757_v41, %v1544_v44  ;;  %v813_v48 = vrot.slane %v808_v46, %v1514_v12 }
 0x114   :  { %v1401_v51 = vld [vmem:[#allocation2 + $0x6c] ss:$16 sps:$4 sm:$0xff]   ;;  %v1304_v43 = vcombine.low %v737_v40, %v737_v40 }
 0x115   :  { %556 = vmatprep.subr.bf16.mxu1 %v1401_v51  ;;  %516 = vmatpush1.bf16.msra.mxu0 %v1403_v52  ;;  %v1305_v47 = vcombine.low %v762_v45, %v762_v45  ;;  %v1307_v49 = vcombine.low %v813_v48, %v813_v48 }
 0x116   :  { %557 = vmatpush1.bf16.msra.mxu1 %v1404_v53  ;;  %1296 = vmatprep.subr.msk.bf16.mxu0 %vm496_vm8, %v1293_v54  ;;  %v780_v53 = vld [vmem:[%s1828_s1] sm:$0x8] }
 0x117   :  { %v401_v56 = vld [vmem:[#allocation2 + $0x88] sm:$0xff]  ;;  %v782_v54 = vshrl.u32 %v780_v53, 16 }
 0x118   :  { %v1295_v57 = vcombine.high %v401_v56, %v401_v56  ;;  %v1294_v58 = vcombine.low %v401_v56, %v401_v56  ;;  %v594_v56 = vld [vmem:[%s1832_s3] sm:$0xff] }
 0x119   :  { %518 = vmatpush1.bf16.msra.mxu0 %v498_v59  ;;  %v783_v55 = vpack.i.b16 %v782_v54, %v782_v54 }
 0x11a   :  { %1298 = vmatprep.subr.msk.bf16.mxu1 %vm496_vm8, %v1295_v57  ;;  %v504_v61 = vsel %vm496_vm8, %v1294_v58, 0  ;;  %1340 = vmatprep.subr.bf16.mxu0 %v1434_v29 }
 0x11b   :  { %559 = vmatpush1.bf16.msra.mxu1 %v504_v61  ;;  %v788_v57 = vrot.slane %v783_v55, %v1544_v44 }
 0x11c   :  { %1297 = vmatmul.mubr.msk.bf16.vlgmr.msra.gmra.mrb[0].mxu0 %vm492_vm9, %v383_v62  ;;  %1354 = vmatprep.subr.bf16.mxu1 %v1434_v29 }
 0x11d   :  { %v1306_v61 = vcombine.low %v788_v57, %v788_v57  ;;  %1350 = vmatprep.mubr.msk.bf16.mxu0 %vm1435_vm10, %v1434_v29 }
 0x11e   :  { %1299 = vmatmul.mubr.msk.bf16.vlgmr.msra.gmra.mrb[0].mxu1 %vm492_vm9, %v383_v62 }
 0x11f   :  { %1364 = vmatprep.mubr.msk.bf16.mxu1 %vm1435_vm10, %v1434_v29 }
 0x1ef   :  { %v543_v63 = vpop.f32.mrb[0].mxu0 }
 0x1f0   :  { %v545_v1 = vpop.f32.mrb[1].mxu0 }
 0x1f1   :  { %v584_v0 = vpop.f32.mrb[0].mxu1  ;;  %v591_v2 = vmax.f32 %v543_v63, %v545_v1  ;;  %v547_v4 = vpop.f32.mrb[2].mxu0 }
 0x1f2   :  { %v586_v3 = vpop.f32.mrb[1].mxu1  ;;  %v548_v7 = vpop.f32.mrb[3].mxu0 }
 0x1f3   :  { %v592_v5 = vmax.f32 %v584_v0, %v586_v3  ;;  %v588_v6 = vpop.f32.mrb[2].mxu1 }
 0x1f4   :  { %v589_v8 = vpop.f32.mrb[3].mxu1 }
 0x1f5   :  { %v593_v9 = vmax.f32 %v591_v2, %v592_v5 }
 0x1f7   :  { %596 = vadd.xlane.f32.xlu0 %v593_v9 }
 0x284   :  { %v597_v10 = vpop.xlane.xlu0 %596 }
 0x285   :  { %v598_v11 = vmul.f32 0.0078125, %v597_v10 }
 0x287   :  { %v1645_v13 = vsub.f32 %v593_v9, %v598_v11 }
 0x289   :  { %v600_v14 = vmul.f32 %v1645_v13, %v1645_v13 }
 0x28b   :  { %601 = vadd.xlane.f32.xlu1 %v600_v14 }
 0x29c   :  { %615 = vperm.xlu1 %1380, %v595_v16  }
 0x2a0   :  { %636 = vrot.lane.b32.xlu1 %v1300_v27, %s1425_s16 }
 0x2a4   :  { %662 = vrot.lane.b32.xlu1 %v1301_v33, %s1426_s17 }
 0x2a8   :  { %687 = vrot.lane.b32.xlu1 %v1302_v35, %s1428_s25 }
 0x2ac   :  { %713 = vrot.lane.b32.xlu1 %v1303_v39, %s1427_s22 }
 0x2b0   :  { %741 = vrot.lane.b32.xlu1 %v1304_v43, %s1429_s26 }
 0x2b4   :  { %766 = vrot.lane.b32.xlu1 %v1305_v47, %s1430_s27 }
 0x2b8   :  { %817 = vrot.lane.b32.xlu1 %v1307_v49, %s1432_s29 }
 0x318   :  { %v602_v50 = vpop.xlane.xlu1 %601 }
 0x319   :  { %v603_v51 = vmul.f32 0.0078125, %v602_v50 }
 0x31b   :  { %v604_v52 = vadd.f32 1e-05, %v603_v51 }
 0x31c   :  { %v616_v62 = vpop.permute.xlu1 %615 }
 0x31d   :  { %1419 = vrsqrt.f32 %v604_v52 }
 0x320   :  { %v637_v63 = vpop.permute.xlu1 %636 }
 0x321   :  { %v638_v9 = vrot.slane %v637_v63, 4 }
 0x323   :  { %v639_v19 = vsel %vm54_vm0, %v638_v9, %v637_v63 }
 0x324   :  { %v663_v0 = vpop.permute.xlu1 %662 }
 0x325   :  { %v664_v10 = vrot.slane %v663_v0, 4 }
 0x327   :  { %v1420_v58 = vpop.eup %1419 }
 0x328   :  { %v606_v59 = vmul.f32 %v1420_v58, %v594_v56  ;;  %v688_v1 = vpop.permute.xlu1 %687 }
 0x329   :  { %v689_v20 = vrot.slane %v688_v1, 4 }
 0x32a   :  { %609 = vperm.xlu0 %1379, %v606_v59  }
 0x32b   :  { %v690_v28 = vsel %vm199_vm3, %v689_v20, %v688_v1 }
 0x32c   :  { %v714_v4 = vpop.permute.xlu1 %713 }
 0x32d   :  { %v715_v14 = vrot.slane %v714_v4, 4 }
 0x32e   :  { %792 = vrot.lane.b32.xlu0 %v1306_v61, %s1431_s28 }
 0x32f   :  { %v716_v23 = vsel %vm136_vm2, %v715_v14, %v714_v4 }
 0x330   :  { %v742_v8 = vpop.permute.xlu1 %741 }
 0x331   :  { %v743_v24 = vrot.slane %v742_v8, 4 }
 0x333   :  { %v744_v31 = vsel %vm144_vm4, %v743_v24, %v742_v8 }
 0x334   :  { %v767_v11 = vpop.permute.xlu1 %766 }
 0x335   :  { %v768_v25 = vrot.slane %v767_v11, 4 }
 0x337   :  { %v769_v32 = vsel %vm207_vm5, %v768_v25, %v767_v11  ;;  %v830_v11 = vld [vmem:[%s1833_s5] sm:$0xf] }
 0x338   :  { %v818_v27 = vpop.permute.xlu1 %817 }
 0x339   :  { %v819_v35 = vrot.slane %v818_v27, 4 }
 0x33b   :  { %v820_v39 = vsel %vm62_vm7, %v819_v35, %v818_v27 }
 0x3a9   :  { %v610_v2 = vpop.permute.xlu0 %609 }
 0x3aa   :  { %v612_v3 = vmul.f32 %v610_v2, %v1645_v13  ;;  %v665_v13 = vsel %vm82_vm1, %v664_v10, %v663_v0 }
 0x3ac   :  { %v618_v5 = vadd.f32 %v616_v62, %v612_v3 }
 0x3ad   :  { %v793_v26 = vpop.permute.xlu0 %792 }
 0x3ae   :  { %v1696_v6 = vmax.f32 %v618_v5, 0.0  ;;  %v794_v33 = vrot.slane %v793_v26, 4 }
 0x3b0   :  { %v622_v7 = vpack.c.bf16 %v1696_v6, %v1696_v6  ;;  %v795_v38 = vsel %vm90_vm6, %v794_v33, %v793_v26  ;;  %v1020_v26 = vld [vmem:[%s1828_s1] sm:$0x2] }
 0x3b2   :  { %623 = vst [vmem:[#allocation3 + $0x4] sm:$0xf] %v622_v7 }
 0x3b9   :  { %v726_v16 = vld [vmem:[#allocation3 + $0x4] sm:$0xf] }
 0x3ba   :  { %v700_v17 = vld [vmem:[#allocation3] sm:$0xff]  ;;  %727 = vst [vmem:[#allocation4 + $0x10] sm:$0xf] %v726_v16 }
 0x3bb   :  { %v728_v18 = vld [vmem:[#allocation3 + $0x4] sm:$0xff]  ;;  %939 = vst [vmem:[#allocation3] sm:$0xf] %v1433_v60  ;;  %v641_v21 = vmul.bf16 %v700_v17, %v639_v19  ;;  %v667_v22 = vmul.bf16 %v700_v17, %v665_v13  ;;  %v692_v30 = vmul.bf16 %v700_v17, %v690_v28  ;;  %v1022_v28 = vshrl.u32 %v1020_v26, 16 }
 0x3bc   :  { %940 = vst [vmem:[#allocation3 + $0x8] sm:$0xf] %v1433_v60  ;;  %v718_v60 = vmul.bf16 %v716_v23, %v700_v17  ;;  %v746_v36 = vmul.bf16 %v744_v31, %v728_v18  ;;  %v771_v37 = vmul.bf16 %v769_v32, %v728_v18  ;;  %v797_v40 = vmul.bf16 %v795_v38, %v728_v18  ;;  %v969_v23 = vld [vmem:[%s1828_s1] sm:$0x1]  ;;  %v1074_v31 = vld [vmem:[%s1828_s1] sm:$0x8] }
 0x3bd   :  { %643 = vrot.lane.b32.xlu0 %v641_v21, %s1432_s29  ;;  %669 = vrot.lane.b32.xlu1 %v667_v22, %s1431_s28  ;;  %v822_v41 = vmul.bf16 %v820_v39, %v728_v18  ;;  %v914_v22 = vld [vmem:[%s1834_s7] sm:$0xff]  ;;  %v971_v24 = vshrl.u32 %v969_v23, 16  ;;  %v1076_v33 = vpack.i.b16 %v1074_v31, %v1074_v31 }
 0x3bf   :  { %v972_v25 = vpack.i.b16 %v971_v24, %v971_v24 }
 0x3c1   :  { %694 = vrot.lane.b32.xlu0 %v692_v30, %s1430_s27  ;;  %720 = vrot.lane.b32.xlu1 %v718_v60, %s1429_s26  ;;  %v977_v27 = vrot.slane %v972_v25, %v1514_v12  ;;  %v1023_v30 = vpack.i.b16 %v1022_v28, %v1022_v28 }
 0x3c3   :  { %v1315_v60 = vcombine.low %v977_v27, %v977_v27  ;;  %v1028_v32 = vrot.slane %v1023_v30, %v1516_v15 }
 0x3c5   :  { %748 = vrot.lane.b32.xlu0 %v746_v36, %s1427_s22  ;;  %773 = vrot.lane.b32.xlu1 %v771_v37, %s1428_s25  ;;  %v1317_v35 = vcombine.low %v1028_v32, %v1028_v32  ;;  %v1081_v36 = vrot.slane %v1076_v33, %v1544_v44  ;;  %v1125_v37 = vld [vmem:[%s1828_s1 + $0x4] sm:$0x1] }
 0x3c6   :  { %v1127_v39 = vpack.i.b16 %v1125_v37, %v1125_v37 }
 0x3c7   :  { %v1319_v38 = vcombine.low %v1081_v36, %v1081_v36 }
 0x3c9   :  { %799 = vrot.lane.b32.xlu0 %v797_v40, %s1426_s17  ;;  %824 = vrot.lane.b32.xlu1 %v822_v41, %s1425_s16  ;;  %v1132_v40 = vrot.slane %v1127_v39, %v1514_v12 }
 0x3cb   :  { %v1321_v41 = vcombine.low %v1132_v40, %v1132_v40 }
 0x42f   :  { %v644_v42 = vpop.permute.xlu0 %643  ;;  %v670_v43 = vpop.permute.xlu1 %669 }
 0x430   :  { %v645_v45 = vrot.slane %v644_v42, 4  ;;  %v671_v46 = vrot.slane %v670_v43, 4 }
 0x432   :  { %v646_v47 = vsel %vm62_vm7, %v644_v42, %v645_v45  ;;  %v672_v48 = vsel %vm90_vm6, %v670_v43, %v671_v46  ;;  %v944_v46 = vld [vmem:[%s1828_s1] sm:$0x1] }
 0x433   :  { %648 = vst [vmem:[#allocation4] sm:$0xf] %v646_v47  ;;  %674 = vst [vmem:[#allocation4 + $0x4] sm:$0xf] %v672_v48  ;;  %v695_v49 = vpop.permute.xlu0 %694  ;;  %v721_v50 = vpop.permute.xlu1 %720  ;;  %v946_v47 = vpack.i.b16 %v944_v46, %v944_v46  ;;  %v995_v48 = vld [vmem:[%s1828_s1] sm:$0x2] }
 0x434   :  { %v696_v51 = vrot.slane %v695_v49, 4  ;;  %v722_v52 = vrot.slane %v721_v50, 4 }
 0x436   :  { %v697_v53 = vsel %vm207_vm5, %v695_v49, %v696_v51  ;;  %v723_v54 = vsel %vm144_vm4, %v721_v50, %v722_v52  ;;  %v1048_v49 = vld [vmem:[%s1828_s1] sm:$0x4]  ;;  %v951_v51 = vrot.slane %v946_v47, %v1514_v12  ;;  %v997_v52 = vpack.i.b16 %v995_v48, %v995_v48 }
 0x437   :  { %699 = vst [vmem:[#allocation4 + $0x8] sm:$0xf] %v697_v53  ;;  %725 = vst [vmem:[#allocation4 + $0xc] sm:$0xf] %v723_v54  ;;  %v749_v55 = vpop.permute.xlu0 %748  ;;  %v774_v56 = vpop.permute.xlu1 %773  ;;  %v913_v50 = vld [vmem:[%s1835_s6] sm:$0xff]  ;;  %v1050_v53 = vshrl.u32 %v1048_v49, 16 }
 0x438   :  { %v750_v57 = vrot.slane %v749_v55, 4  ;;  %v775_v58 = vrot.slane %v774_v56, 4 }
 0x43a   :  { %v751_v59 = vsel %vm136_vm2, %v749_v55, %v750_v57  ;;  %v776_v61 = vsel %vm199_vm3, %v774_v56, %v775_v58  ;;  %v1409_v62 = vld [vmem:[#allocation4] sm:$0xff]   ;;  %v1314_v57 = vcombine.low %v951_v51, %v951_v51  ;;  %v1002_v58 = vrot.slane %v997_v52, %v1516_v15 }
 0x43b   :  { %753 = vst [vmem:[#allocation4 + $0x14] sm:$0xf] %v751_v59  ;;  %778 = vst [vmem:[#allocation4 + $0x18] sm:$0xf] %v776_v61  ;;  %v800_v63 = vpop.permute.xlu0 %799  ;;  %v825_v0 = vpop.permute.xlu1 %824  ;;  %1341 = vmatpush3.bf16.msra.mxu0 %v1409_v62  ;;  %v1099_v55 = vld [vmem:[%s1828_s1] sm:$0x8]  ;;  %v1051_v59 = vpack.i.b16 %v1050_v53, %v1050_v53 }
 0x43c   :  { %v801_v1 = vrot.slane %v800_v63, 4  ;;  %v826_v2 = vrot.slane %v825_v0, 4  ;;  %1342 = vmatprep.subr.bf16.mxu0 %v1434_v29  ;;  %v1101_v61 = vshrl.u32 %v1099_v55, 16  ;;  %v1316_v62 = vcombine.low %v1002_v58, %v1002_v58 }
 0x43e   :  { %v802_v3 = vsel %vm82_vm1, %v800_v63, %v801_v1  ;;  %v827_v4 = vsel %vm54_vm0, %v825_v0, %v826_v2  ;;  %v1410_v5 = vld [vmem:[#allocation4 + $0x8] sm:$0xff]   ;;  %v1056_v63 = vrot.slane %v1051_v59, %v1532_v34  ;;  %v1102_v12 = vpack.i.b16 %v1101_v61, %v1101_v61 }
 0x43f   :  { %804 = vst [vmem:[#allocation4 + $0x1c] sm:$0xf] %v802_v3  ;;  %829 = vst [vmem:[#allocation4 + $0x20] sm:$0xf] %v827_v4  ;;  %1343 = vmatpush3.bf16.msra.mxu0 %v1410_v5 }
 0x440   :  { %1344 = vmatprep.subr.bf16.mxu0 %v1434_v29  ;;  %v1318_v0 = vcombine.low %v1056_v63, %v1056_v63  ;;  %v1107_v1 = vrot.slane %v1102_v12, %v1544_v44 }
 0x442   :  { %v1411_v7 = vld [vmem:[#allocation4 + $0x10] sm:$0xff]   ;;  %v1320_v2 = vcombine.low %v1107_v1, %v1107_v1 }
 0x443   :  { %1345 = vmatpush3.bf16.msra.mxu0 %v1411_v7 }
 0x444   :  { %1346 = vmatprep.subr.bf16.mxu0 %v1434_v29 }
 0x446   :  { %v1412_v8 = vld [vmem:[#allocation4 + $0x18] sm:$0xff]   ;;  %v1413_v9 = vld [vmem:[#allocation4 + $0x20] ss:$0 sps:$4 sm:$0xff]  }
 0x447   :  { %1347 = vmatpush3.bf16.msra.mxu0 %v1412_v8  ;;  %v871_v10 = vsel %vm496_vm8, %v1413_v9, 0 }
 0x448   :  { %1348 = vmatprep.subr.bf16.mxu0 %v1434_v29 }
 0x44b   :  { %1349 = vmatpush3.bf16.msra.mxu0 %v871_v10 }
 0x44e   :  { %1351 = vmatmul.mubr.msk.bf16.vlgmr.msra.gmra.mrb[4].mxu0 %vm492_vm9, %v830_v11 }
 0x521   :  { %v907_v14 = vpop.f32.mrb[4].mxu0 }
 0x522   :  { %915 = vadd.xlane.f32.xlu0 %v907_v14  ;;  %v1352_v16 = vpop.f32.mrb[5].mxu0 }
 0x523   :  { %v910_v17 = vpop.f32.mrb[6].mxu0 }
 0x524   :  { %v1353_v18 = vpop.f32.mrb[7].mxu0 }
 0x5af   :  { %v916_v19 = vpop.xlane.xlu0 %915 }
 0x5b0   :  { %v917_v13 = vmul.f32 0.0078125, %v916_v19 }
 0x5b2   :  { %v918_v20 = vsub.f32 %v907_v14, %v917_v13 }
 0x5b4   :  { %v919_v21 = vmul.f32 %v918_v20, %v918_v20 }
 0x5b6   :  { %920 = vadd.xlane.f32.xlu1 %v919_v21 }
 0x5c7   :  { %934 = vperm.xlu1 %1380, %v914_v22  }
 0x5cb   :  { %981 = vrot.lane.b32.xlu1 %v1315_v60, %s1426_s17 }
 0x5cf   :  { %1032 = vrot.lane.b32.xlu1 %v1317_v35, %s1427_s22 }
 0x5d3   :  { %1085 = vrot.lane.b32.xlu1 %v1319_v38, %s1430_s27 }
 0x5d7   :  { %1136 = vrot.lane.b32.xlu1 %v1321_v41, %s1432_s29 }
 0x643   :  { %v921_v42 = vpop.xlane.xlu1 %920 }
 0x644   :  { %v922_v43 = vmul.f32 0.0078125, %v921_v42 }
 0x646   :  { %v923_v45 = vadd.f32 1e-05, %v922_v43 }
 0x647   :  { %v935_v3 = vpop.permute.xlu1 %934 }
 0x648   :  { %1421 = vrsqrt.f32 %v923_v45 }
 0x64b   :  { %v982_v5 = vpop.permute.xlu1 %981 }
 0x64c   :  { %v983_v14 = vrot.slane %v982_v5, 4 }
 0x64e   :  { %v984_v21 = vsel %vm82_vm1, %v983_v14, %v982_v5 }
 0x64f   :  { %v1033_v34 = vpop.permute.xlu1 %1032 }
 0x650   :  { %v1034_v18 = vrot.slane %v1033_v34, 4 }
 0x652   :  { %v1422_v54 = vpop.eup %1421  ;;  %v1035_v25 = vsel %vm136_vm2, %v1034_v18, %v1033_v34 }
 0x653   :  { %v925_v56 = vmul.f32 %v1422_v54, %v913_v50  ;;  %v1086_v17 = vpop.permute.xlu1 %1085 }
 0x654   :  { %v1087_v27 = vrot.slane %v1086_v17, 4 }
 0x655   :  { %928 = vperm.xlu0 %1379, %v925_v56  }
 0x656   :  { %v1088_v35 = vsel %vm207_vm5, %v1087_v27, %v1086_v17 }
 0x657   :  { %v1137_v60 = vpop.permute.xlu1 %1136 }
 0x658   :  { %v1138_v37 = vrot.slane %v1137_v60, 4 }
 0x659   :  { %955 = vrot.lane.b32.xlu0 %v1314_v57, %s1425_s16 }
 0x65a   :  { %v1139_v41 = vsel %vm62_vm7, %v1138_v37, %v1137_v60 }
 0x65d   :  { %1006 = vrot.lane.b32.xlu0 %v1316_v62, %s1428_s25 }
 0x661   :  { %1060 = vrot.lane.b32.xlu0 %v1318_v0, %s1429_s26 }
 0x665   :  { %1111 = vrot.lane.b32.xlu0 %v1320_v2, %s1431_s28 }
 0x6d4   :  { %v929_v15 = vpop.permute.xlu0 %928 }
 0x6d5   :  { %v931_v4 = vmul.f32 %v929_v15, %v918_v20 }
 0x6d7   :  { %v937_v7 = vadd.f32 %v935_v3, %v931_v4 }
 0x6d8   :  { %v956_v8 = vpop.permute.xlu0 %955 }
 0x6d9   :  { %v938_v9 = vmax.f32 %v937_v7, 0.0  ;;  %v957_v16 = vrot.slane %v956_v8, 4 }
 0x6db   :  { %v941_v10 = vpack.c.bf16 %v938_v9, %v938_v9  ;;  %v958_v22 = vsel %vm54_vm0, %v957_v16, %v956_v8 }
 0x6dc   :  { %v1007_v11 = vpop.permute.xlu0 %1006 }
 0x6dd   :  { %942 = vst [vmem:[#allocation3 + $0x4] sm:$0xf] %v941_v10  ;;  %v1008_v19 = vrot.slane %v1007_v11, 4 }
 0x6df   :  { %v1009_v26 = vsel %vm199_vm3, %v1008_v19, %v1007_v11  ;;  %v1149_v11 = vld [vmem:[%s1836_s8] sm:$0xf] }
 0x6e0   :  { %v1061_v44 = vpop.permute.xlu0 %1060 }
 0x6e1   :  { %v1062_v28 = vrot.slane %v1061_v44, 4 }
 0x6e3   :  { %v1063_v36 = vsel %vm144_vm4, %v1062_v28, %v1061_v44 }
 0x6e4   :  { %v968_v13 = vld [vmem:[#allocation3] sm:$0xff]  ;;  %v1112_v30 = vpop.permute.xlu0 %1111 }
 0x6e5   :  { %v1045_v20 = vld [vmem:[#allocation3 + $0x4] sm:$0xf]  ;;  %v986_v23 = vmul.bf16 %v984_v21, %v968_v13  ;;  %v960_v24 = vmul.bf16 %v968_v13, %v958_v22  ;;  %v1037_v31 = vmul.bf16 %v1035_v25, %v968_v13  ;;  %v1011_v32 = vmul.bf16 %v1009_v26, %v968_v13 }
 0x6e6   :  { %1046 = vst [vmem:[#allocation4 + $0x10] sm:$0xf] %v1045_v20  ;;  %v1073_v33 = vld [vmem:[#allocation3 + $0x4] sm:$0xff]  ;;  %v1113_v38 = vrot.slane %v1112_v30, 4 }
 0x6e7   :  { %962 = vrot.lane.b32.xlu0 %v960_v24, %s1432_s29  ;;  %988 = vrot.lane.b32.xlu1 %v986_v23, %s1431_s28  ;;  %v1090_v39 = vmul.bf16 %v1088_v35, %v1073_v33  ;;  %v1065_v40 = vmul.bf16 %v1073_v33, %v1063_v36  ;;  %v1141_v43 = vmul.bf16 %v1139_v41, %v1073_v33  ;;  %v1232_v24 = vld [vmem:[%s1838_s9] sm:$0xff] }
 0x6e8   :  { %v1114_v42 = vsel %vm90_vm6, %v1113_v38, %v1112_v30 }
 0x6e9   :  { %v1116_v45 = vmul.bf16 %v1114_v42, %v1073_v33 }
 0x6eb   :  { %1013 = vrot.lane.b32.xlu0 %v1011_v32, %s1430_s27  ;;  %1039 = vrot.lane.b32.xlu1 %v1037_v31, %s1429_s26 }
 0x6ef   :  { %1067 = vrot.lane.b32.xlu0 %v1065_v40, %s1427_s22  ;;  %1092 = vrot.lane.b32.xlu1 %v1090_v39, %s1428_s25 }
 0x6f3   :  { %1118 = vrot.lane.b32.xlu0 %v1116_v45, %s1426_s17  ;;  %1143 = vrot.lane.b32.xlu1 %v1141_v43, %s1425_s16 }
 0x759   :  { %v963_v46 = vpop.permute.xlu0 %962  ;;  %v989_v47 = vpop.permute.xlu1 %988 }
 0x75a   :  { %v964_v48 = vrot.slane %v963_v46, 4  ;;  %v990_v49 = vrot.slane %v989_v47, 4 }
 0x75c   :  { %v965_v50 = vsel %vm62_vm7, %v963_v46, %v964_v48  ;;  %v991_v51 = vsel %vm90_vm6, %v989_v47, %v990_v49 }
 0x75d   :  { %967 = vst [vmem:[#allocation4] sm:$0xf] %v965_v50  ;;  %993 = vst [vmem:[#allocation4 + $0x4] sm:$0xf] %v991_v51  ;;  %v1014_v52 = vpop.permute.xlu0 %1013  ;;  %v1040_v53 = vpop.permute.xlu1 %1039 }
 0x75e   :  { %v1015_v54 = vrot.slane %v1014_v52, 4  ;;  %v1041_v55 = vrot.slane %v1040_v53, 4 }
 0x760   :  { %v1016_v56 = vsel %vm207_vm5, %v1014_v52, %v1015_v54  ;;  %v1042_v57 = vsel %vm144_vm4, %v1040_v53, %v1041_v55 }
 0x761   :  { %1018 = vst [vmem:[#allocation4 + $0x8] sm:$0xf] %v1016_v56  ;;  %1044 = vst [vmem:[#allocation4 + $0xc] sm:$0xf] %v1042_v57  ;;  %v1068_v58 = vpop.permute.xlu0 %1067  ;;  %v1093_v59 = vpop.permute.xlu1 %1092 }
 0x762   :  { %v1069_v61 = vrot.slane %v1068_v58, 4  ;;  %v1094_v62 = vrot.slane %v1093_v59, 4 }
 0x764   :  { %v1070_v63 = vsel %vm136_vm2, %v1068_v58, %v1069_v61  ;;  %v1095_v12 = vsel %vm199_vm3, %v1093_v59, %v1094_v62  ;;  %v1414_v0 = vld [vmem:[#allocation4] sm:$0xff]  }
 0x765   :  { %1072 = vst [vmem:[#allocation4 + $0x14] sm:$0xf] %v1070_v63  ;;  %1097 = vst [vmem:[#allocation4 + $0x18] sm:$0xf] %v1095_v12  ;;  %v1119_v1 = vpop.permute.xlu0 %1118  ;;  %v1144_v2 = vpop.permute.xlu1 %1143  ;;  %1355 = vmatpush3.bf16.msra.mxu1 %v1414_v0 }
 0x766   :  { %v1120_v3 = vrot.slane %v1119_v1, 4  ;;  %v1145_v15 = vrot.slane %v1144_v2, 4  ;;  %1356 = vmatprep.subr.bf16.mxu1 %v1434_v29 }
 0x768   :  { %v1121_v4 = vsel %vm82_vm1, %v1119_v1, %v1120_v3  ;;  %v1146_v5 = vsel %vm54_vm0, %v1144_v2, %v1145_v15  ;;  %v1415_v7 = vld [vmem:[#allocation4 + $0x8] sm:$0xff]  }
 0x769   :  { %1123 = vst [vmem:[#allocation4 + $0x1c] sm:$0xf] %v1121_v4  ;;  %1148 = vst [vmem:[#allocation4 + $0x20] sm:$0xf] %v1146_v5  ;;  %1357 = vmatpush3.bf16.msra.mxu1 %v1415_v7 }
 0x76a   :  { %1358 = vmatprep.subr.bf16.mxu1 %v1434_v29 }
 0x76c   :  { %v1416_v8 = vld [vmem:[#allocation4 + $0x10] sm:$0xff]  }
 0x76d   :  { %1359 = vmatpush3.bf16.msra.mxu1 %v1416_v8 }
 0x76e   :  { %1360 = vmatprep.subr.bf16.mxu1 %v1434_v29 }
 0x770   :  { %v1417_v9 = vld [vmem:[#allocation4 + $0x18] sm:$0xff]   ;;  %v1418_v10 = vld [vmem:[#allocation4 + $0x20] ss:$0 sps:$4 sm:$0xff]  }
 0x771   :  { %1361 = vmatpush3.bf16.msra.mxu1 %v1417_v9  ;;  %v1190_v34 = vsel %vm496_vm8, %v1418_v10, 0 }
 0x772   :  { %1362 = vmatprep.subr.bf16.mxu1 %v1434_v29  ;;  %v1233_v29 = vld [vmem:[%s1837_s10] sm:$0xff] }
 0x775   :  { %1363 = vmatpush3.bf16.msra.mxu1 %v1190_v34 }
 0x778   :  { %1365 = vmatmul.mubr.msk.bf16.vlgmr.msra.gmra.mrb[4].mxu1 %vm492_vm9, %v1149_v11 }
 0x84b   :  { %v1226_v14 = vpop.f32.mrb[4].mxu1 }
 0x84c   :  { %1234 = vadd.xlane.f32.xlu0 %v1226_v14  ;;  %v1366_v16 = vpop.f32.mrb[5].mxu1 }
 0x84d   :  { %v1229_v17 = vpop.f32.mrb[6].mxu1 }
 0x84e   :  { %v1367_v44 = vpop.f32.mrb[7].mxu1 }
 0x8d9   :  { %v1235_v18 = vpop.xlane.xlu0 %1234 }
 0x8da   :  { %v1236_v19 = vmul.f32 0.0078125, %v1235_v18 }
 0x8dc   :  { %v1237_v13 = vsub.f32 %v1226_v14, %v1236_v19 }
 0x8de   :  { %v1238_v21 = vmul.f32 %v1237_v13, %v1237_v13 }
 0x8e0   :  { %1239 = vadd.xlane.f32.xlu1 %v1238_v21 }
 0x8f1   :  { %1253 = vperm.xlu1 %1380, %v1233_v29  }
 0x96d   :  { %v1240_v22 = vpop.xlane.xlu1 %1239 }
 0x96e   :  { %v1241_v20 = vmul.f32 0.0078125, %v1240_v22 }
 0x970   :  { %v1242_v23 = vadd.f32 1e-05, %v1241_v20 }
 0x971   :  { %v1254_v60 = vpop.permute.xlu1 %1253 }
 0x972   :  { %1423 = vrsqrt.f32 %v1242_v23 }
 0x97c   :  { %v1424_v25 = vpop.eup %1423 }
 0x97d   :  { %v1244_v26 = vmul.f32 %v1424_v25, %v1232_v24 }
 0x97f   :  { %1247 = vperm.xlu0 %1379, %v1244_v26  }
 0x9fe   :  { %v1248_v27 = vpop.permute.xlu0 %1247 }
 0x9ff   :  { %v1250_v28 = vmul.f32 %v1248_v27, %v1237_v13 }
 0xa01   :  { %v1256_v30 = vadd.f32 %v1254_v60, %v1250_v28 }
 0xa03   :  { %v1257_v31 = vmax.f32 %v1256_v30, 0.0 }
 0xa05   :  { %v1258_v32 = vadd.f32 %v1257_v31, %v1696_v6 }
 0xa07   :  { %1259 = vst [vmem:[%s1839_s11] sm:$0xff] %v1258_v32 }

</bundles_post_ra>
